<compile_context>
chip_gen: v7x
topology: tpu7x:2x2x1
jax: 0.10.0
libtpu: 0.0.40
codegen_flags: <defaults>
</compile_context>

<pallas_src>
import functools
import math

import jax
import jax.numpy as jnp
from jax.experimental import pallas as pl
from jax.experimental.pallas import tpu as pltpu

# ----------------------------- config -------------------------------------- #
B, S, H = 2, 8, 32          # batch, sequence, hidden
NH, DH = 4, 8               # heads, head dim (NH * DH == H)
FF = 64                     # intermediate (FFN) size
LAYERS = 2
NUM_CLASS = 3
LANG_CLASS = 4
OUT_PAD = 128               # lane-dense padded width for the fused head output
VOCAB = 100
TYPE_VOCAB = 2
LN_EPS = 1e-12
NEG_INF = -1e9


# --------------------------- shared helpers -------------------------------- #
def _layer_norm(x, gamma, beta):
    mu = jnp.mean(x, axis=-1, keepdims=True)
    var = jnp.mean((x - mu) ** 2, axis=-1, keepdims=True)
    return (x - mu) * jax.lax.rsqrt(var + LN_EPS) * gamma + beta


def _erf_approx(x):
    # Abramowitz & Stegun 7.1.26, max abs error ~1.5e-7 (elementary ops only).
    a1, a2, a3, a4, a5 = (0.254829592, -0.284496736, 1.421413741,
                          -1.453152027, 1.061405429)
    p = 0.3275911
    sgn = jnp.where(x >= 0.0, 1.0, -1.0)
    ax = jnp.abs(x)
    t = 1.0 / (1.0 + p * ax)
    poly = ((((a5 * t + a4) * t + a3) * t + a2) * t + a1) * t
    return sgn * (1.0 - poly * jnp.exp(-ax * ax))


def _gelu_exact(x):
    # PyTorch nn.GELU default (erf form): 0.5 * x * (1 + erf(x / sqrt(2)))
    return 0.5 * x * (1.0 + _erf_approx(x * 0.7071067811865476))


def _full_spec(shape):
    nd = len(shape)
    return pl.BlockSpec(shape, lambda i, nd=nd: (0,) * nd)


# ------------------------ single fused forward kernel ---------------------- #
def fused_forward_kernel(x_ref, mask_ref, embg_ref, embb_ref,
                         wqkv_ref, bqkv_ref, wo_ref, bo_ref,
                         ln1g_ref, ln1b_ref, w1_ref, b1_ref, w2_ref, b2_ref,
                         ln2g_ref, ln2b_ref, hw_ref, hb_ref,
                         out_ref):
    # ---- embedding LayerNorm (prologue), activations kept as (B*S, H) ----- #
    h = _layer_norm(x_ref[...], embg_ref[...], embb_ref[...])        # (16, 32)

    # Additive attention-mask bias: computed once, reused by both layers.
    bias = ((1.0 - mask_ref[...]) * NEG_INF)[:, None, :]             # (B, 1, S)
    scale = 1.0 / math.sqrt(DH)

    for l in range(LAYERS):                                          # static unroll
        # -------- fused QKV projection: one (16,32)x(32,96) matmul --------- #
        qkv = jnp.dot(h, wqkv_ref[l],
                      preferred_element_type=jnp.float32) + bqkv_ref[l]
        qkv3 = qkv.reshape(B, S, 3 * H)
        q = qkv3[:, :, 0:H] * scale                                  # (B, S, H)
        k = qkv3[:, :, H:2 * H]
        v = qkv3[:, :, 2 * H:3 * H]

        wo_l = wo_ref[l]                                             # (H, H)
        attn = jnp.zeros((B, S, H), jnp.float32)
        for hd in range(NH):                                         # static unroll
            sl = slice(hd * DH, (hd + 1) * DH)
            s = jnp.einsum('bqd,bkd->bqk', q[:, :, sl], k[:, :, sl],
                           preferred_element_type=jnp.float32) + bias
            m = jnp.max(s, axis=-1, keepdims=True)
            p = jnp.exp(s - m)
            p = p * pl.reciprocal(jnp.sum(p, axis=-1, keepdims=True),
                                  approx=True)
            ctx = jnp.einsum('bqk,bkd->bqd', p, v[:, :, sl],
                             preferred_element_type=jnp.float32)
            # accumulate through the matching slab of W_o (avoids lane concat)
            attn = attn + jnp.einsum('bsd,dh->bsh', ctx, wo_l[sl, :],
                                     preferred_element_type=jnp.float32)

        attn2d = attn.reshape(B * S, H) + bo_ref[l]
        h1 = _layer_norm(h + attn2d, ln1g_ref[l], ln1b_ref[l])

        # ------------------------------ FFN -------------------------------- #
        ff = jnp.dot(h1, w1_ref[l],
                     preferred_element_type=jnp.float32) + b1_ref[l]
        ff = _gelu_exact(ff)
        ff = jnp.dot(ff, w2_ref[l],
                     preferred_element_type=jnp.float32) + b2_ref[l]

        h = _layer_norm(h1 + ff, ln2g_ref[l], ln2b_ref[l])

    # ---- AdaptiveAvgPool1d(1) over the sequence (mask-unaware, as in ref) -- #
    cls = jnp.mean(h.reshape(B, S, H), axis=1)                       # (B, H)
    # nn.Dropout(p=0.2) is identity at inference time.
    # Fused (fc | lang_fc | zero-pad) head: single lane-dense (B, 128) store.
    out_ref[...] = jnp.dot(cls, hw_ref[...],
                           preferred_element_type=jnp.float32) + hb_ref[...]


def run_fused_model(x2d, mask, p):
    args = (x2d, mask, p['emb_ln_g'], p['emb_ln_b'],
            p['wqkv'], p['bqkv'], p['wo'], p['bo'],
            p['ln1_g'], p['ln1_b'], p['w1'], p['b1'], p['w2'], p['b2'],
            p['ln2_g'], p['ln2_b'], p['head_w'], p['head_b'])
    return pl.pallas_call(
        fused_forward_kernel,
        grid=(1,),
        in_specs=[_full_spec(a.shape) for a in args],
        out_specs=_full_spec((B, OUT_PAD)),
        out_shape=jax.ShapeDtypeStruct((B, OUT_PAD), jnp.float32),
        compiler_params=pltpu.CompilerParams(
            dimension_semantics=("arbitrary",)),
    )(*args)


# ------------------------- parameter initialization ------------------------ #
def init_params(key):
    std = 0.02
    keys = iter(jax.random.split(key, 32))

    def normal(shape):
        return std * jax.random.normal(next(keys), shape, dtype=jnp.float32)

    params = {
        'word_emb': normal((VOCAB, H)),
        'pos_emb': normal((S, H)),
        'type_emb': normal((TYPE_VOCAB, H)),
        'emb_ln_g': jnp.ones((1, H), jnp.float32),
        'emb_ln_b': jnp.zeros((1, H), jnp.float32),
        # stacked per-layer weights (fused QKV)
        'wqkv': normal((LAYERS, H, 3 * H)),
        'bqkv': jnp.zeros((LAYERS, 1, 3 * H), jnp.float32),
        'wo': normal((LAYERS, H, H)),
        'bo': jnp.zeros((LAYERS, 1, H), jnp.float32),
        'ln1_g': jnp.ones((LAYERS, 1, H), jnp.float32),
        'ln1_b': jnp.zeros((LAYERS, 1, H), jnp.float32),
        'w1': normal((LAYERS, H, FF)),
        'b1': jnp.zeros((LAYERS, 1, FF), jnp.float32),
        'w2': normal((LAYERS, FF, H)),
        'b2': jnp.zeros((LAYERS, 1, H), jnp.float32),
        'ln2_g': jnp.ones((LAYERS, 1, H), jnp.float32),
        'ln2_b': jnp.zeros((LAYERS, 1, H), jnp.float32),
    }
    # Fused + lane-padded classifier heads: cols [0:3]=fc, [3:7]=lang_fc, rest 0.
    fc_w = normal((H, NUM_CLASS))
    lang_w = normal((H, LANG_CLASS))
    head_w = jnp.zeros((H, OUT_PAD), jnp.float32)
    head_w = head_w.at[:, :NUM_CLASS].set(fc_w)
    head_w = head_w.at[:, NUM_CLASS:NUM_CLASS + LANG_CLASS].set(lang_w)
    params['head_w'] = head_w
    params['head_b'] = jnp.zeros((1, OUT_PAD), jnp.float32)
    return params


# --------------------------------- forward --------------------------------- #
def forward(params, input_ids, attention_mask, lang_id_task=True):
    # Embedding lookup + sum (tiny XLA glue gather); LayerNorm happens inside
    # the fused Pallas kernel so x is written to HBM only once.
    x = (params['word_emb'][input_ids]
         + params['pos_emb'][None, :, :]
         + params['type_emb'][0][None, None, :])           # (B, S, H), pre-LN
    x2d = x.reshape(B * S, H)
    mask_f = attention_mask.astype(jnp.float32)

    out = run_fused_model(x2d, mask_f, params)              # (B, OUT_PAD)
    logits = out[:, :NUM_CLASS]
    lang_logits = (out[:, NUM_CLASS:NUM_CLASS + LANG_CLASS]
                   if lang_id_task else None)
    return logits, lang_logits


# ----------------------------------- main ----------------------------------- #
if __name__ == "__main__":
    key = jax.random.PRNGKey(0)
    k_param, k_ids = jax.random.split(key)

    params = init_params(k_param)
    input_ids = jax.random.randint(k_ids, (B, S), 0, VOCAB, dtype=jnp.int32)
    attention_mask = jnp.concatenate(
        [jnp.ones((B, S - 2), jnp.int32), jnp.zeros((B, 2), jnp.int32)], axis=1)

    fwd = jax.jit(functools.partial(forward, lang_id_task=True))
    logits, lang_logits = fwd(params, input_ids, attention_mask)
    jax.block_until_ready(logits)
    jax.block_until_ready(lang_logits)

    assert logits.shape == (B, NUM_CLASS)
    assert lang_logits.shape == (B, LANG_CLASS)
    print("KERNEL_OK")
</pallas_src>

<mosaic_0001>
module attributes {stable_mosaic.version = 11 : i64} {
  func.func @fused_forward_kernel(%arg0: i32, %arg1: memref<16x32xf32, #tpu.memory_space<vmem>>, %arg2: memref<2x8xf32, #tpu.memory_space<vmem>>, %arg3: memref<1x32xf32, #tpu.memory_space<vmem>>, %arg4: memref<1x32xf32, #tpu.memory_space<vmem>>, %arg5: memref<2x32x96xf32, #tpu.memory_space<vmem>>, %arg6: memref<2x1x96xf32, #tpu.memory_space<vmem>>, %arg7: memref<2x32x32xf32, #tpu.memory_space<vmem>>, %arg8: memref<2x1x32xf32, #tpu.memory_space<vmem>>, %arg9: memref<2x1x32xf32, #tpu.memory_space<vmem>>, %arg10: memref<2x1x32xf32, #tpu.memory_space<vmem>>, %arg11: memref<2x32x64xf32, #tpu.memory_space<vmem>>, %arg12: memref<2x1x64xf32, #tpu.memory_space<vmem>>, %arg13: memref<2x64x32xf32, #tpu.memory_space<vmem>>, %arg14: memref<2x1x32xf32, #tpu.memory_space<vmem>>, %arg15: memref<2x1x32xf32, #tpu.memory_space<vmem>>, %arg16: memref<2x1x32xf32, #tpu.memory_space<vmem>>, %arg17: memref<32x128xf32, #tpu.memory_space<vmem>>, %arg18: memref<1x128xf32, #tpu.memory_space<vmem>>, %arg19: memref<2x128xf32, #tpu.memory_space<vmem>>) attributes {dimension_semantics = [#tpu.dimension_semantics<arbitrary>], iteration_bounds = array<i64: 1>, scalar_prefetch = 0 : i64, scratch_operands = 0 : i64, tpu.core_type = #tpu.core_type<tc>, window_params = [{pipeline_mode = #tpu.pipeline_mode<synchronous>, transform_indices = @transform_0, window_bounds = array<i64: 16, 32>}, {pipeline_mode = #tpu.pipeline_mode<synchronous>, transform_indices = @transform_1, window_bounds = array<i64: 2, 8>}, {pipeline_mode = #tpu.pipeline_mode<synchronous>, transform_indices = @transform_2, window_bounds = array<i64: 1, 32>}, {pipeline_mode = #tpu.pipeline_mode<synchronous>, transform_indices = @transform_3, window_bounds = array<i64: 1, 32>}, {pipeline_mode = #tpu.pipeline_mode<synchronous>, transform_indices = @transform_4, window_bounds = array<i64: 2, 32, 96>}, {pipeline_mode = #tpu.pipeline_mode<synchronous>, transform_indices = @transform_5, window_bounds = array<i64: 2, 1, 96>}, {pipeline_mode = #tpu.pipeline_mode<synchronous>, transform_indices = @transform_6, window_bounds = array<i64: 2, 32, 32>}, {pipeline_mode = #tpu.pipeline_mode<synchronous>, transform_indices = @transform_7, window_bounds = array<i64: 2, 1, 32>}, {pipeline_mode = #tpu.pipeline_mode<synchronous>, transform_indices = @transform_8, window_bounds = array<i64: 2, 1, 32>}, {pipeline_mode = #tpu.pipeline_mode<synchronous>, transform_indices = @transform_9, window_bounds = array<i64: 2, 1, 32>}, {pipeline_mode = #tpu.pipeline_mode<synchronous>, transform_indices = @transform_10, window_bounds = array<i64: 2, 32, 64>}, {pipeline_mode = #tpu.pipeline_mode<synchronous>, transform_indices = @transform_11, window_bounds = array<i64: 2, 1, 64>}, {pipeline_mode = #tpu.pipeline_mode<synchronous>, transform_indices = @transform_12, window_bounds = array<i64: 2, 64, 32>}, {pipeline_mode = #tpu.pipeline_mode<synchronous>, transform_indices = @transform_13, window_bounds = array<i64: 2, 1, 32>}, {pipeline_mode = #tpu.pipeline_mode<synchronous>, transform_indices = @transform_14, window_bounds = array<i64: 2, 1, 32>}, {pipeline_mode = #tpu.pipeline_mode<synchronous>, transform_indices = @transform_15, window_bounds = array<i64: 2, 1, 32>}, {pipeline_mode = #tpu.pipeline_mode<synchronous>, transform_indices = @transform_16, window_bounds = array<i64: 32, 128>}, {pipeline_mode = #tpu.pipeline_mode<synchronous>, transform_indices = @transform_17, window_bounds = array<i64: 1, 128>}, {pipeline_mode = #tpu.pipeline_mode<synchronous>, transform_indices = @transform_18, window_bounds = array<i64: 2, 128>}]} {
    %c0 = arith.constant 0 : index
    %c0_0 = arith.constant 0 : index
    %0 = vector.load %arg1[%c0, %c0_0] : memref<16x32xf32, #tpu.memory_space<vmem>>, vector<16x32xf32>
    %c0_1 = arith.constant 0 : index
    %c0_2 = arith.constant 0 : index
    %1 = vector.load %arg3[%c0_1, %c0_2] : memref<1x32xf32, #tpu.memory_space<vmem>>, vector<1x32xf32>
    %c0_3 = arith.constant 0 : index
    %c0_4 = arith.constant 0 : index
    %2 = vector.load %arg4[%c0_3, %c0_4] : memref<1x32xf32, #tpu.memory_space<vmem>>, vector<1x32xf32>
    %cst = arith.constant dense<0.000000e+00> : vector<16xf32>
    %3 = vector.multi_reduction <add>, %0, %cst [1] : vector<16x32xf32> to vector<16xf32>
    %4 = vector.shape_cast %3 : vector<16xf32> to vector<16x1xf32>
    %cst_5 = arith.constant 3.200000e+01 : f32
    %5 = vector.broadcast %cst_5 : f32 to vector<16x1xf32>
    %6 = arith.divf %4, %5 : vector<16x1xf32>
    %7 = vector.broadcast %6 : vector<16x1xf32> to vector<16x32xf32>
    %8 = arith.subf %0, %7 : vector<16x32xf32>
    %9 = arith.mulf %8, %8 : vector<16x32xf32>
    %cst_6 = arith.constant dense<0.000000e+00> : vector<16xf32>
    %10 = vector.multi_reduction <add>, %9, %cst_6 [1] : vector<16x32xf32> to vector<16xf32>
    %11 = vector.shape_cast %10 : vector<16xf32> to vector<16x1xf32>
    %cst_7 = arith.constant 3.200000e+01 : f32
    %12 = vector.broadcast %cst_7 : f32 to vector<16x1xf32>
    %13 = arith.divf %11, %12 : vector<16x1xf32>
    %14 = vector.broadcast %6 : vector<16x1xf32> to vector<16x32xf32>
    %15 = arith.subf %0, %14 : vector<16x32xf32>
    %cst_8 = arith.constant 9.99999996E-13 : f32
    %16 = vector.broadcast %cst_8 : f32 to vector<16x1xf32>
    %17 = arith.addf %13, %16 : vector<16x1xf32>
    %18 = math.rsqrt %17 : vector<16x1xf32>
    %19 = vector.broadcast %18 : vector<16x1xf32> to vector<16x32xf32>
    %20 = arith.mulf %15, %19 : vector<16x32xf32>
    %21 = vector.broadcast %1 : vector<1x32xf32> to vector<16x32xf32>
    %22 = arith.mulf %20, %21 : vector<16x32xf32>
    %23 = vector.broadcast %2 : vector<1x32xf32> to vector<16x32xf32>
    %24 = arith.addf %22, %23 : vector<16x32xf32>
    %c0_9 = arith.constant 0 : index
    %c0_10 = arith.constant 0 : index
    %25 = vector.load %arg2[%c0_9, %c0_10] : memref<2x8xf32, #tpu.memory_space<vmem>>, vector<2x8xf32>
    %cst_11 = arith.constant 1.000000e+00 : f32
    %26 = vector.broadcast %cst_11 : f32 to vector<2x8xf32>
    %27 = arith.subf %26, %25 : vector<2x8xf32>
    %cst_12 = arith.constant -1.000000e+09 : f32
    %28 = vector.broadcast %cst_12 : f32 to vector<2x8xf32>
    %29 = arith.mulf %27, %28 : vector<2x8xf32>
    %30 = vector.shape_cast %29 : vector<2x8xf32> to vector<2x1x8xf32>
    %c0_13 = arith.constant 0 : index
    %c0_14 = arith.constant 0 : index
    %c0_15 = arith.constant 0 : index
    %31 = vector.load %arg5[%c0_13, %c0_14, %c0_15] : memref<2x32x96xf32, #tpu.memory_space<vmem>>, vector<1x32x96xf32>
    %32 = vector.shape_cast %31 : vector<1x32x96xf32> to vector<32x96xf32>
    %cst_16 = arith.constant dense<0.000000e+00> : vector<16x96xf32>
    %33 = tpu.matmul %24, %32, %cst_16 {dimension_numbers = #tpu.dot_dimension_numbers<[1], [0], [0], [1], [0, 0, 1, 1], [], []>} : vector<16x32xf32>, vector<32x96xf32>, vector<16x96xf32> -> vector<16x96xf32>
    %c0_17 = arith.constant 0 : index
    %c0_18 = arith.constant 0 : index
    %c0_19 = arith.constant 0 : index
    %34 = vector.load %arg6[%c0_17, %c0_18, %c0_19] : memref<2x1x96xf32, #tpu.memory_space<vmem>>, vector<1x1x96xf32>
    %35 = vector.shape_cast %34 : vector<1x1x96xf32> to vector<1x96xf32>
    %36 = vector.broadcast %35 : vector<1x96xf32> to vector<16x96xf32>
    %37 = arith.addf %33, %36 : vector<16x96xf32>
    %38 = vector.shape_cast %37 : vector<16x96xf32> to vector<2x8x96xf32>
    %39 = vector.extract_strided_slice %38 {offsets = [0, 0, 0], sizes = [2, 8, 32], strides = [1, 1, 1]} : vector<2x8x96xf32> to vector<2x8x32xf32>
    %cst_20 = arith.constant 0.353553385 : f32
    %40 = vector.broadcast %cst_20 : f32 to vector<2x8x32xf32>
    %41 = arith.mulf %39, %40 : vector<2x8x32xf32>
    %42 = vector.extract_strided_slice %38 {offsets = [0, 0, 32], sizes = [2, 8, 32], strides = [1, 1, 1]} : vector<2x8x96xf32> to vector<2x8x32xf32>
    %43 = vector.extract_strided_slice %38 {offsets = [0, 0, 64], sizes = [2, 8, 32], strides = [1, 1, 1]} : vector<2x8x96xf32> to vector<2x8x32xf32>
    %c0_21 = arith.constant 0 : index
    %c0_22 = arith.constant 0 : index
    %c0_23 = arith.constant 0 : index
    %44 = vector.load %arg7[%c0_21, %c0_22, %c0_23] : memref<2x32x32xf32, #tpu.memory_space<vmem>>, vector<1x32x32xf32>
    %45 = vector.shape_cast %44 : vector<1x32x32xf32> to vector<32x32xf32>
    %cst_24 = arith.constant 0.000000e+00 : f32
    %46 = vector.broadcast %cst_24 : f32 to vector<2x8x32xf32>
    %47 = vector.extract_strided_slice %41 {offsets = [0, 0, 0], sizes = [2, 8, 8], strides = [1, 1, 1]} : vector<2x8x32xf32> to vector<2x8x8xf32>
    %48 = vector.extract_strided_slice %42 {offsets = [0, 0, 0], sizes = [2, 8, 8], strides = [1, 1, 1]} : vector<2x8x32xf32> to vector<2x8x8xf32>
    "tpu.trace_start"() <{level = 10 : i32, message = "bqd,bkd->bqk"}> : () -> ()
    %cst_25 = arith.constant dense<0.000000e+00> : vector<2x8x8xf32>
    %49 = tpu.matmul %47, %48, %cst_25 {dimension_numbers = #tpu.dot_dimension_numbers<[2], [2], [1], [1], [0, 0, 0, 1, 1, 1], [0], [0]>} : vector<2x8x8xf32>, vector<2x8x8xf32>, vector<2x8x8xf32> -> vector<2x8x8xf32>
    "tpu.trace_stop"() : () -> ()
    %50 = vector.broadcast %30 : vector<2x1x8xf32> to vector<2x8x8xf32>
    %51 = arith.addf %49, %50 : vector<2x8x8xf32>
    %cst_26 = arith.constant dense<0xFF800000> : vector<2x8xf32>
    %52 = vector.multi_reduction <maximumf>, %51, %cst_26 [2] : vector<2x8x8xf32> to vector<2x8xf32>
    %53 = vector.shape_cast %52 : vector<2x8xf32> to vector<2x8x1xf32>
    %54 = vector.broadcast %53 : vector<2x8x1xf32> to vector<2x8x8xf32>
    %55 = arith.subf %51, %54 : vector<2x8x8xf32>
    %56 = math.exp %55 : vector<2x8x8xf32>
    %cst_27 = arith.constant dense<0.000000e+00> : vector<2x8xf32>
    %57 = vector.multi_reduction <add>, %56, %cst_27 [2] : vector<2x8x8xf32> to vector<2x8xf32>
    %58 = vector.shape_cast %57 : vector<2x8xf32> to vector<2x8x1xf32>
    %59 = tpu.reciprocal %58 {approx = true} : vector<2x8x1xf32> -> vector<2x8x1xf32>
    %60 = vector.broadcast %59 : vector<2x8x1xf32> to vector<2x8x8xf32>
    %61 = arith.mulf %56, %60 : vector<2x8x8xf32>
    %62 = vector.extract_strided_slice %43 {offsets = [0, 0, 0], sizes = [2, 8, 8], strides = [1, 1, 1]} : vector<2x8x32xf32> to vector<2x8x8xf32>
    "tpu.trace_start"() <{level = 10 : i32, message = "bqk,bkd->bqd"}> : () -> ()
    %cst_28 = arith.constant dense<0.000000e+00> : vector<2x8x8xf32>
    %63 = tpu.matmul %61, %62, %cst_28 {dimension_numbers = #tpu.dot_dimension_numbers<[2], [1], [1], [2], [0, 0, 0, 1, 1, 2], [0], [0]>} : vector<2x8x8xf32>, vector<2x8x8xf32>, vector<2x8x8xf32> -> vector<2x8x8xf32>
    "tpu.trace_stop"() : () -> ()
    %64 = vector.extract_strided_slice %45 {offsets = [0, 0], sizes = [8, 32], strides = [1, 1]} : vector<32x32xf32> to vector<8x32xf32>
    "tpu.trace_start"() <{level = 10 : i32, message = "bsd,dh->bsh"}> : () -> ()
    %cst_29 = arith.constant dense<0.000000e+00> : vector<2x8x32xf32>
    %65 = tpu.matmul %63, %64, %cst_29 {dimension_numbers = #tpu.dot_dimension_numbers<[2], [0], [0, 1], [1], [0, 0, 0, 1, 1, 1], [], []>} : vector<2x8x8xf32>, vector<8x32xf32>, vector<2x8x32xf32> -> vector<2x8x32xf32>
    "tpu.trace_stop"() : () -> ()
    %66 = arith.addf %46, %65 : vector<2x8x32xf32>
    %67 = vector.extract_strided_slice %41 {offsets = [0, 0, 8], sizes = [2, 8, 8], strides = [1, 1, 1]} : vector<2x8x32xf32> to vector<2x8x8xf32>
    %68 = vector.extract_strided_slice %42 {offsets = [0, 0, 8], sizes = [2, 8, 8], strides = [1, 1, 1]} : vector<2x8x32xf32> to vector<2x8x8xf32>
    "tpu.trace_start"() <{level = 10 : i32, message = "bqd,bkd->bqk"}> : () -> ()
    %cst_30 = arith.constant dense<0.000000e+00> : vector<2x8x8xf32>
    %69 = tpu.matmul %67, %68, %cst_30 {dimension_numbers = #tpu.dot_dimension_numbers<[2], [2], [1], [1], [0, 0, 0, 1, 1, 1], [0], [0]>} : vector<2x8x8xf32>, vector<2x8x8xf32>, vector<2x8x8xf32> -> vector<2x8x8xf32>
    "tpu.trace_stop"() : () -> ()
    %70 = vector.broadcast %30 : vector<2x1x8xf32> to vector<2x8x8xf32>
    %71 = arith.addf %69, %70 : vector<2x8x8xf32>
    %cst_31 = arith.constant dense<0xFF800000> : vector<2x8xf32>
    %72 = vector.multi_reduction <maximumf>, %71, %cst_31 [2] : vector<2x8x8xf32> to vector<2x8xf32>
    %73 = vector.shape_cast %72 : vector<2x8xf32> to vector<2x8x1xf32>
    %74 = vector.broadcast %73 : vector<2x8x1xf32> to vector<2x8x8xf32>
    %75 = arith.subf %71, %74 : vector<2x8x8xf32>
    %76 = math.exp %75 : vector<2x8x8xf32>
    %cst_32 = arith.constant dense<0.000000e+00> : vector<2x8xf32>
    %77 = vector.multi_reduction <add>, %76, %cst_32 [2] : vector<2x8x8xf32> to vector<2x8xf32>
    %78 = vector.shape_cast %77 : vector<2x8xf32> to vector<2x8x1xf32>
    %79 = tpu.reciprocal %78 {approx = true} : vector<2x8x1xf32> -> vector<2x8x1xf32>
    %80 = vector.broadcast %79 : vector<2x8x1xf32> to vector<2x8x8xf32>
    %81 = arith.mulf %76, %80 : vector<2x8x8xf32>
    %82 = vector.extract_strided_slice %43 {offsets = [0, 0, 8], sizes = [2, 8, 8], strides = [1, 1, 1]} : vector<2x8x32xf32> to vector<2x8x8xf32>
    "tpu.trace_start"() <{level = 10 : i32, message = "bqk,bkd->bqd"}> : () -> ()
    %cst_33 = arith.constant dense<0.000000e+00> : vector<2x8x8xf32>
    %83 = tpu.matmul %81, %82, %cst_33 {dimension_numbers = #tpu.dot_dimension_numbers<[2], [1], [1], [2], [0, 0, 0, 1, 1, 2], [0], [0]>} : vector<2x8x8xf32>, vector<2x8x8xf32>, vector<2x8x8xf32> -> vector<2x8x8xf32>
    "tpu.trace_stop"() : () -> ()
    %84 = vector.extract_strided_slice %45 {offsets = [8, 0], sizes = [8, 32], strides = [1, 1]} : vector<32x32xf32> to vector<8x32xf32>
    "tpu.trace_start"() <{level = 10 : i32, message = "bsd,dh->bsh"}> : () -> ()
    %cst_34 = arith.constant dense<0.000000e+00> : vector<2x8x32xf32>
    %85 = tpu.matmul %83, %84, %cst_34 {dimension_numbers = #tpu.dot_dimension_numbers<[2], [0], [0, 1], [1], [0, 0, 0, 1, 1, 1], [], []>} : vector<2x8x8xf32>, vector<8x32xf32>, vector<2x8x32xf32> -> vector<2x8x32xf32>
    "tpu.trace_stop"() : () -> ()
    %86 = arith.addf %66, %85 : vector<2x8x32xf32>
    %87 = vector.extract_strided_slice %41 {offsets = [0, 0, 16], sizes = [2, 8, 8], strides = [1, 1, 1]} : vector<2x8x32xf32> to vector<2x8x8xf32>
    %88 = vector.extract_strided_slice %42 {offsets = [0, 0, 16], sizes = [2, 8, 8], strides = [1, 1, 1]} : vector<2x8x32xf32> to vector<2x8x8xf32>
    "tpu.trace_start"() <{level = 10 : i32, message = "bqd,bkd->bqk"}> : () -> ()
    %cst_35 = arith.constant dense<0.000000e+00> : vector<2x8x8xf32>
    %89 = tpu.matmul %87, %88, %cst_35 {dimension_numbers = #tpu.dot_dimension_numbers<[2], [2], [1], [1], [0, 0, 0, 1, 1, 1], [0], [0]>} : vector<2x8x8xf32>, vector<2x8x8xf32>, vector<2x8x8xf32> -> vector<2x8x8xf32>
    "tpu.trace_stop"() : () -> ()
    %90 = vector.broadcast %30 : vector<2x1x8xf32> to vector<2x8x8xf32>
    %91 = arith.addf %89, %90 : vector<2x8x8xf32>
    %cst_36 = arith.constant dense<0xFF800000> : vector<2x8xf32>
    %92 = vector.multi_reduction <maximumf>, %91, %cst_36 [2] : vector<2x8x8xf32> to vector<2x8xf32>
    %93 = vector.shape_cast %92 : vector<2x8xf32> to vector<2x8x1xf32>
    %94 = vector.broadcast %93 : vector<2x8x1xf32> to vector<2x8x8xf32>
    %95 = arith.subf %91, %94 : vector<2x8x8xf32>
    %96 = math.exp %95 : vector<2x8x8xf32>
    %cst_37 = arith.constant dense<0.000000e+00> : vector<2x8xf32>
    %97 = vector.multi_reduction <add>, %96, %cst_37 [2] : vector<2x8x8xf32> to vector<2x8xf32>
    %98 = vector.shape_cast %97 : vector<2x8xf32> to vector<2x8x1xf32>
    %99 = tpu.reciprocal %98 {approx = true} : vector<2x8x1xf32> -> vector<2x8x1xf32>
    %100 = vector.broadcast %99 : vector<2x8x1xf32> to vector<2x8x8xf32>
    %101 = arith.mulf %96, %100 : vector<2x8x8xf32>
    %102 = vector.extract_strided_slice %43 {offsets = [0, 0, 16], sizes = [2, 8, 8], strides = [1, 1, 1]} : vector<2x8x32xf32> to vector<2x8x8xf32>
    "tpu.trace_start"() <{level = 10 : i32, message = "bqk,bkd->bqd"}> : () -> ()
    %cst_38 = arith.constant dense<0.000000e+00> : vector<2x8x8xf32>
    %103 = tpu.matmul %101, %102, %cst_38 {dimension_numbers = #tpu.dot_dimension_numbers<[2], [1], [1], [2], [0, 0, 0, 1, 1, 2], [0], [0]>} : vector<2x8x8xf32>, vector<2x8x8xf32>, vector<2x8x8xf32> -> vector<2x8x8xf32>
    "tpu.trace_stop"() : () -> ()
    %104 = vector.extract_strided_slice %45 {offsets = [16, 0], sizes = [8, 32], strides = [1, 1]} : vector<32x32xf32> to vector<8x32xf32>
    "tpu.trace_start"() <{level = 10 : i32, message = "bsd,dh->bsh"}> : () -> ()
    %cst_39 = arith.constant dense<0.000000e+00> : vector<2x8x32xf32>
    %105 = tpu.matmul %103, %104, %cst_39 {dimension_numbers = #tpu.dot_dimension_numbers<[2], [0], [0, 1], [1], [0, 0, 0, 1, 1, 1], [], []>} : vector<2x8x8xf32>, vector<8x32xf32>, vector<2x8x32xf32> -> vector<2x8x32xf32>
    "tpu.trace_stop"() : () -> ()
    %106 = arith.addf %86, %105 : vector<2x8x32xf32>
    %107 = vector.extract_strided_slice %41 {offsets = [0, 0, 24], sizes = [2, 8, 8], strides = [1, 1, 1]} : vector<2x8x32xf32> to vector<2x8x8xf32>
    %108 = vector.extract_strided_slice %42 {offsets = [0, 0, 24], sizes = [2, 8, 8], strides = [1, 1, 1]} : vector<2x8x32xf32> to vector<2x8x8xf32>
    "tpu.trace_start"() <{level = 10 : i32, message = "bqd,bkd->bqk"}> : () -> ()
    %cst_40 = arith.constant dense<0.000000e+00> : vector<2x8x8xf32>
    %109 = tpu.matmul %107, %108, %cst_40 {dimension_numbers = #tpu.dot_dimension_numbers<[2], [2], [1], [1], [0, 0, 0, 1, 1, 1], [0], [0]>} : vector<2x8x8xf32>, vector<2x8x8xf32>, vector<2x8x8xf32> -> vector<2x8x8xf32>
    "tpu.trace_stop"() : () -> ()
    %110 = vector.broadcast %30 : vector<2x1x8xf32> to vector<2x8x8xf32>
    %111 = arith.addf %109, %110 : vector<2x8x8xf32>
    %cst_41 = arith.constant dense<0xFF800000> : vector<2x8xf32>
    %112 = vector.multi_reduction <maximumf>, %111, %cst_41 [2] : vector<2x8x8xf32> to vector<2x8xf32>
    %113 = vector.shape_cast %112 : vector<2x8xf32> to vector<2x8x1xf32>
    %114 = vector.broadcast %113 : vector<2x8x1xf32> to vector<2x8x8xf32>
    %115 = arith.subf %111, %114 : vector<2x8x8xf32>
    %116 = math.exp %115 : vector<2x8x8xf32>
    %cst_42 = arith.constant dense<0.000000e+00> : vector<2x8xf32>
    %117 = vector.multi_reduction <add>, %116, %cst_42 [2] : vector<2x8x8xf32> to vector<2x8xf32>
    %118 = vector.shape_cast %117 : vector<2x8xf32> to vector<2x8x1xf32>
    %119 = tpu.reciprocal %118 {approx = true} : vector<2x8x1xf32> -> vector<2x8x1xf32>
    %120 = vector.broadcast %119 : vector<2x8x1xf32> to vector<2x8x8xf32>
    %121 = arith.mulf %116, %120 : vector<2x8x8xf32>
    %122 = vector.extract_strided_slice %43 {offsets = [0, 0, 24], sizes = [2, 8, 8], strides = [1, 1, 1]} : vector<2x8x32xf32> to vector<2x8x8xf32>
    "tpu.trace_start"() <{level = 10 : i32, message = "bqk,bkd->bqd"}> : () -> ()
    %cst_43 = arith.constant dense<0.000000e+00> : vector<2x8x8xf32>
    %123 = tpu.matmul %121, %122, %cst_43 {dimension_numbers = #tpu.dot_dimension_numbers<[2], [1], [1], [2], [0, 0, 0, 1, 1, 2], [0], [0]>} : vector<2x8x8xf32>, vector<2x8x8xf32>, vector<2x8x8xf32> -> vector<2x8x8xf32>
    "tpu.trace_stop"() : () -> ()
    %124 = vector.extract_strided_slice %45 {offsets = [24, 0], sizes = [8, 32], strides = [1, 1]} : vector<32x32xf32> to vector<8x32xf32>
    "tpu.trace_start"() <{level = 10 : i32, message = "bsd,dh->bsh"}> : () -> ()
    %cst_44 = arith.constant dense<0.000000e+00> : vector<2x8x32xf32>
    %125 = tpu.matmul %123, %124, %cst_44 {dimension_numbers = #tpu.dot_dimension_numbers<[2], [0], [0, 1], [1], [0, 0, 0, 1, 1, 1], [], []>} : vector<2x8x8xf32>, vector<8x32xf32>, vector<2x8x32xf32> -> vector<2x8x32xf32>
    "tpu.trace_stop"() : () -> ()
    %126 = arith.addf %106, %125 : vector<2x8x32xf32>
    %127 = vector.shape_cast %126 : vector<2x8x32xf32> to vector<16x32xf32>
    %c0_45 = arith.constant 0 : index
    %c0_46 = arith.constant 0 : index
    %c0_47 = arith.constant 0 : index
    %128 = vector.load %arg8[%c0_45, %c0_46, %c0_47] : memref<2x1x32xf32, #tpu.memory_space<vmem>>, vector<1x1x32xf32>
    %129 = vector.shape_cast %128 : vector<1x1x32xf32> to vector<1x32xf32>
    %130 = vector.broadcast %129 : vector<1x32xf32> to vector<16x32xf32>
    %131 = arith.addf %127, %130 : vector<16x32xf32>
    %132 = arith.addf %24, %131 : vector<16x32xf32>
    %c0_48 = arith.constant 0 : index
    %c0_49 = arith.constant 0 : index
    %c0_50 = arith.constant 0 : index
    %133 = vector.load %arg9[%c0_48, %c0_49, %c0_50] : memref<2x1x32xf32, #tpu.memory_space<vmem>>, vector<1x1x32xf32>
    %134 = vector.shape_cast %133 : vector<1x1x32xf32> to vector<1x32xf32>
    %c0_51 = arith.constant 0 : index
    %c0_52 = arith.constant 0 : index
    %c0_53 = arith.constant 0 : index
    %135 = vector.load %arg10[%c0_51, %c0_52, %c0_53] : memref<2x1x32xf32, #tpu.memory_space<vmem>>, vector<1x1x32xf32>
    %136 = vector.shape_cast %135 : vector<1x1x32xf32> to vector<1x32xf32>
    %cst_54 = arith.constant dense<0.000000e+00> : vector<16xf32>
    %137 = vector.multi_reduction <add>, %132, %cst_54 [1] : vector<16x32xf32> to vector<16xf32>
    %138 = vector.shape_cast %137 : vector<16xf32> to vector<16x1xf32>
    %cst_55 = arith.constant 3.200000e+01 : f32
    %139 = vector.broadcast %cst_55 : f32 to vector<16x1xf32>
    %140 = arith.divf %138, %139 : vector<16x1xf32>
    %141 = vector.broadcast %140 : vector<16x1xf32> to vector<16x32xf32>
    %142 = arith.subf %132, %141 : vector<16x32xf32>
    %143 = arith.mulf %142, %142 : vector<16x32xf32>
    %cst_56 = arith.constant dense<0.000000e+00> : vector<16xf32>
    %144 = vector.multi_reduction <add>, %143, %cst_56 [1] : vector<16x32xf32> to vector<16xf32>
    %145 = vector.shape_cast %144 : vector<16xf32> to vector<16x1xf32>
    %cst_57 = arith.constant 3.200000e+01 : f32
    %146 = vector.broadcast %cst_57 : f32 to vector<16x1xf32>
    %147 = arith.divf %145, %146 : vector<16x1xf32>
    %148 = vector.broadcast %140 : vector<16x1xf32> to vector<16x32xf32>
    %149 = arith.subf %132, %148 : vector<16x32xf32>
    %cst_58 = arith.constant 9.99999996E-13 : f32
    %150 = vector.broadcast %cst_58 : f32 to vector<16x1xf32>
    %151 = arith.addf %147, %150 : vector<16x1xf32>
    %152 = math.rsqrt %151 : vector<16x1xf32>
    %153 = vector.broadcast %152 : vector<16x1xf32> to vector<16x32xf32>
    %154 = arith.mulf %149, %153 : vector<16x32xf32>
    %155 = vector.broadcast %134 : vector<1x32xf32> to vector<16x32xf32>
    %156 = arith.mulf %154, %155 : vector<16x32xf32>
    %157 = vector.broadcast %136 : vector<1x32xf32> to vector<16x32xf32>
    %158 = arith.addf %156, %157 : vector<16x32xf32>
    %c0_59 = arith.constant 0 : index
    %c0_60 = arith.constant 0 : index
    %c0_61 = arith.constant 0 : index
    %159 = vector.load %arg11[%c0_59, %c0_60, %c0_61] : memref<2x32x64xf32, #tpu.memory_space<vmem>>, vector<1x32x64xf32>
    %160 = vector.shape_cast %159 : vector<1x32x64xf32> to vector<32x64xf32>
    %cst_62 = arith.constant dense<0.000000e+00> : vector<16x64xf32>
    %161 = tpu.matmul %158, %160, %cst_62 {dimension_numbers = #tpu.dot_dimension_numbers<[1], [0], [0], [1], [0, 0, 1, 1], [], []>} : vector<16x32xf32>, vector<32x64xf32>, vector<16x64xf32> -> vector<16x64xf32>
    %c0_63 = arith.constant 0 : index
    %c0_64 = arith.constant 0 : index
    %c0_65 = arith.constant 0 : index
    %162 = vector.load %arg12[%c0_63, %c0_64, %c0_65] : memref<2x1x64xf32, #tpu.memory_space<vmem>>, vector<1x1x64xf32>
    %163 = vector.shape_cast %162 : vector<1x1x64xf32> to vector<1x64xf32>
    %164 = vector.broadcast %163 : vector<1x64xf32> to vector<16x64xf32>
    %165 = arith.addf %161, %164 : vector<16x64xf32>
    %cst_66 = arith.constant 5.000000e-01 : f32
    %166 = vector.broadcast %cst_66 : f32 to vector<16x64xf32>
    %167 = arith.mulf %166, %165 : vector<16x64xf32>
    %cst_67 = arith.constant 0.707106769 : f32
    %168 = vector.broadcast %cst_67 : f32 to vector<16x64xf32>
    %169 = arith.mulf %165, %168 : vector<16x64xf32>
    %cst_68 = arith.constant 0.000000e+00 : f32
    %170 = vector.broadcast %cst_68 : f32 to vector<16x64xf32>
    %171 = arith.cmpf oge, %169, %170 : vector<16x64xf32>
    %cst_69 = arith.constant 1.000000e+00 : f32
    %cst_70 = arith.constant -1.000000e+00 : f32
    %172 = vector.broadcast %cst_69 : f32 to vector<16x64xf32>
    %173 = vector.broadcast %cst_70 : f32 to vector<16x64xf32>
    %174 = arith.select %171, %172, %173 : vector<16x64xi1>, vector<16x64xf32>
    %175 = math.absf %169 : vector<16x64xf32>
    %cst_71 = arith.constant 0.327591091 : f32
    %176 = vector.broadcast %cst_71 : f32 to vector<16x64xf32>
    %177 = arith.mulf %176, %175 : vector<16x64xf32>
    %cst_72 = arith.constant 1.000000e+00 : f32
    %178 = vector.broadcast %cst_72 : f32 to vector<16x64xf32>
    %179 = arith.addf %178, %177 : vector<16x64xf32>
    %cst_73 = arith.constant 1.000000e+00 : f32
    %180 = vector.broadcast %cst_73 : f32 to vector<16x64xf32>
    %181 = arith.divf %180, %179 : vector<16x64xf32>
    %cst_74 = arith.constant 1.06140542 : f32
    %182 = vector.broadcast %cst_74 : f32 to vector<16x64xf32>
    %183 = arith.mulf %182, %181 : vector<16x64xf32>
    %cst_75 = arith.constant -1.45315206 : f32
    %184 = vector.broadcast %cst_75 : f32 to vector<16x64xf32>
    %185 = arith.addf %183, %184 : vector<16x64xf32>
    %186 = arith.mulf %185, %181 : vector<16x64xf32>
    %cst_76 = arith.constant 1.42141378 : f32
    %187 = vector.broadcast %cst_76 : f32 to vector<16x64xf32>
    %188 = arith.addf %186, %187 : vector<16x64xf32>
    %189 = arith.mulf %188, %181 : vector<16x64xf32>
    %cst_77 = arith.constant -0.284496725 : f32
    %190 = vector.broadcast %cst_77 : f32 to vector<16x64xf32>
    %191 = arith.addf %189, %190 : vector<16x64xf32>
    %192 = arith.mulf %191, %181 : vector<16x64xf32>
    %cst_78 = arith.constant 0.254829586 : f32
    %193 = vector.broadcast %cst_78 : f32 to vector<16x64xf32>
    %194 = arith.addf %192, %193 : vector<16x64xf32>
    %195 = arith.mulf %194, %181 : vector<16x64xf32>
    %cst_79 = arith.constant 0.000000e+00 : f32
    %196 = vector.broadcast %cst_79 : f32 to vector<16x64xf32>
    %197 = arith.subf %196, %175 : vector<16x64xf32>
    %198 = arith.mulf %197, %175 : vector<16x64xf32>
    %199 = math.exp %198 : vector<16x64xf32>
    %200 = arith.mulf %195, %199 : vector<16x64xf32>
    %cst_80 = arith.constant 1.000000e+00 : f32
    %201 = vector.broadcast %cst_80 : f32 to vector<16x64xf32>
    %202 = arith.subf %201, %200 : vector<16x64xf32>
    %203 = arith.mulf %174, %202 : vector<16x64xf32>
    %cst_81 = arith.constant 1.000000e+00 : f32
    %204 = vector.broadcast %cst_81 : f32 to vector<16x64xf32>
    %205 = arith.addf %204, %203 : vector<16x64xf32>
    %206 = arith.mulf %167, %205 : vector<16x64xf32>
    %c0_82 = arith.constant 0 : index
    %c0_83 = arith.constant 0 : index
    %c0_84 = arith.constant 0 : index
    %207 = vector.load %arg13[%c0_82, %c0_83, %c0_84] : memref<2x64x32xf32, #tpu.memory_space<vmem>>, vector<1x64x32xf32>
    %208 = vector.shape_cast %207 : vector<1x64x32xf32> to vector<64x32xf32>
    %cst_85 = arith.constant dense<0.000000e+00> : vector<16x32xf32>
    %209 = tpu.matmul %206, %208, %cst_85 {dimension_numbers = #tpu.dot_dimension_numbers<[1], [0], [0], [1], [0, 0, 1, 1], [], []>} : vector<16x64xf32>, vector<64x32xf32>, vector<16x32xf32> -> vector<16x32xf32>
    %c0_86 = arith.constant 0 : index
    %c0_87 = arith.constant 0 : index
    %c0_88 = arith.constant 0 : index
    %210 = vector.load %arg14[%c0_86, %c0_87, %c0_88] : memref<2x1x32xf32, #tpu.memory_space<vmem>>, vector<1x1x32xf32>
    %211 = vector.shape_cast %210 : vector<1x1x32xf32> to vector<1x32xf32>
    %212 = vector.broadcast %211 : vector<1x32xf32> to vector<16x32xf32>
    %213 = arith.addf %209, %212 : vector<16x32xf32>
    %214 = arith.addf %158, %213 : vector<16x32xf32>
    %c0_89 = arith.constant 0 : index
    %c0_90 = arith.constant 0 : index
    %c0_91 = arith.constant 0 : index
    %215 = vector.load %arg15[%c0_89, %c0_90, %c0_91] : memref<2x1x32xf32, #tpu.memory_space<vmem>>, vector<1x1x32xf32>
    %216 = vector.shape_cast %215 : vector<1x1x32xf32> to vector<1x32xf32>
    %c0_92 = arith.constant 0 : index
    %c0_93 = arith.constant 0 : index
    %c0_94 = arith.constant 0 : index
    %217 = vector.load %arg16[%c0_92, %c0_93, %c0_94] : memref<2x1x32xf32, #tpu.memory_space<vmem>>, vector<1x1x32xf32>
    %218 = vector.shape_cast %217 : vector<1x1x32xf32> to vector<1x32xf32>
    %cst_95 = arith.constant dense<0.000000e+00> : vector<16xf32>
    %219 = vector.multi_reduction <add>, %214, %cst_95 [1] : vector<16x32xf32> to vector<16xf32>
    %220 = vector.shape_cast %219 : vector<16xf32> to vector<16x1xf32>
    %cst_96 = arith.constant 3.200000e+01 : f32
    %221 = vector.broadcast %cst_96 : f32 to vector<16x1xf32>
    %222 = arith.divf %220, %221 : vector<16x1xf32>
    %223 = vector.broadcast %222 : vector<16x1xf32> to vector<16x32xf32>
    %224 = arith.subf %214, %223 : vector<16x32xf32>
    %225 = arith.mulf %224, %224 : vector<16x32xf32>
    %cst_97 = arith.constant dense<0.000000e+00> : vector<16xf32>
    %226 = vector.multi_reduction <add>, %225, %cst_97 [1] : vector<16x32xf32> to vector<16xf32>
    %227 = vector.shape_cast %226 : vector<16xf32> to vector<16x1xf32>
    %cst_98 = arith.constant 3.200000e+01 : f32
    %228 = vector.broadcast %cst_98 : f32 to vector<16x1xf32>
    %229 = arith.divf %227, %228 : vector<16x1xf32>
    %230 = vector.broadcast %222 : vector<16x1xf32> to vector<16x32xf32>
    %231 = arith.subf %214, %230 : vector<16x32xf32>
    %cst_99 = arith.constant 9.99999996E-13 : f32
    %232 = vector.broadcast %cst_99 : f32 to vector<16x1xf32>
    %233 = arith.addf %229, %232 : vector<16x1xf32>
    %234 = math.rsqrt %233 : vector<16x1xf32>
    %235 = vector.broadcast %234 : vector<16x1xf32> to vector<16x32xf32>
    %236 = arith.mulf %231, %235 : vector<16x32xf32>
    %237 = vector.broadcast %216 : vector<1x32xf32> to vector<16x32xf32>
    %238 = arith.mulf %236, %237 : vector<16x32xf32>
    %239 = vector.broadcast %218 : vector<1x32xf32> to vector<16x32xf32>
    %240 = arith.addf %238, %239 : vector<16x32xf32>
    %c1 = arith.constant 1 : index
    %c0_100 = arith.constant 0 : index
    %c0_101 = arith.constant 0 : index
    %241 = vector.load %arg5[%c1, %c0_100, %c0_101] : memref<2x32x96xf32, #tpu.memory_space<vmem>>, vector<1x32x96xf32>
    %242 = vector.shape_cast %241 : vector<1x32x96xf32> to vector<32x96xf32>
    %cst_102 = arith.constant dense<0.000000e+00> : vector<16x96xf32>
    %243 = tpu.matmul %240, %242, %cst_102 {dimension_numbers = #tpu.dot_dimension_numbers<[1], [0], [0], [1], [0, 0, 1, 1], [], []>} : vector<16x32xf32>, vector<32x96xf32>, vector<16x96xf32> -> vector<16x96xf32>
    %c1_103 = arith.constant 1 : index
    %c0_104 = arith.constant 0 : index
    %c0_105 = arith.constant 0 : index
    %244 = vector.load %arg6[%c1_103, %c0_104, %c0_105] : memref<2x1x96xf32, #tpu.memory_space<vmem>>, vector<1x1x96xf32>
    %245 = vector.shape_cast %244 : vector<1x1x96xf32> to vector<1x96xf32>
    %246 = vector.broadcast %245 : vector<1x96xf32> to vector<16x96xf32>
    %247 = arith.addf %243, %246 : vector<16x96xf32>
    %248 = vector.shape_cast %247 : vector<16x96xf32> to vector<2x8x96xf32>
    %249 = vector.extract_strided_slice %248 {offsets = [0, 0, 0], sizes = [2, 8, 32], strides = [1, 1, 1]} : vector<2x8x96xf32> to vector<2x8x32xf32>
    %cst_106 = arith.constant 0.353553385 : f32
    %250 = vector.broadcast %cst_106 : f32 to vector<2x8x32xf32>
    %251 = arith.mulf %249, %250 : vector<2x8x32xf32>
    %252 = vector.extract_strided_slice %248 {offsets = [0, 0, 32], sizes = [2, 8, 32], strides = [1, 1, 1]} : vector<2x8x96xf32> to vector<2x8x32xf32>
    %253 = vector.extract_strided_slice %248 {offsets = [0, 0, 64], sizes = [2, 8, 32], strides = [1, 1, 1]} : vector<2x8x96xf32> to vector<2x8x32xf32>
    %c1_107 = arith.constant 1 : index
    %c0_108 = arith.constant 0 : index
    %c0_109 = arith.constant 0 : index
    %254 = vector.load %arg7[%c1_107, %c0_108, %c0_109] : memref<2x32x32xf32, #tpu.memory_space<vmem>>, vector<1x32x32xf32>
    %255 = vector.shape_cast %254 : vector<1x32x32xf32> to vector<32x32xf32>
    %cst_110 = arith.constant 0.000000e+00 : f32
    %256 = vector.broadcast %cst_110 : f32 to vector<2x8x32xf32>
    %257 = vector.extract_strided_slice %251 {offsets = [0, 0, 0], sizes = [2, 8, 8], strides = [1, 1, 1]} : vector<2x8x32xf32> to vector<2x8x8xf32>
    %258 = vector.extract_strided_slice %252 {offsets = [0, 0, 0], sizes = [2, 8, 8], strides = [1, 1, 1]} : vector<2x8x32xf32> to vector<2x8x8xf32>
    "tpu.trace_start"() <{level = 10 : i32, message = "bqd,bkd->bqk"}> : () -> ()
    %cst_111 = arith.constant dense<0.000000e+00> : vector<2x8x8xf32>
    %259 = tpu.matmul %257, %258, %cst_111 {dimension_numbers = #tpu.dot_dimension_numbers<[2], [2], [1], [1], [0, 0, 0, 1, 1, 1], [0], [0]>} : vector<2x8x8xf32>, vector<2x8x8xf32>, vector<2x8x8xf32> -> vector<2x8x8xf32>
    "tpu.trace_stop"() : () -> ()
    %260 = vector.broadcast %30 : vector<2x1x8xf32> to vector<2x8x8xf32>
    %261 = arith.addf %259, %260 : vector<2x8x8xf32>
    %cst_112 = arith.constant dense<0xFF800000> : vector<2x8xf32>
    %262 = vector.multi_reduction <maximumf>, %261, %cst_112 [2] : vector<2x8x8xf32> to vector<2x8xf32>
    %263 = vector.shape_cast %262 : vector<2x8xf32> to vector<2x8x1xf32>
    %264 = vector.broadcast %263 : vector<2x8x1xf32> to vector<2x8x8xf32>
    %265 = arith.subf %261, %264 : vector<2x8x8xf32>
    %266 = math.exp %265 : vector<2x8x8xf32>
    %cst_113 = arith.constant dense<0.000000e+00> : vector<2x8xf32>
    %267 = vector.multi_reduction <add>, %266, %cst_113 [2] : vector<2x8x8xf32> to vector<2x8xf32>
    %268 = vector.shape_cast %267 : vector<2x8xf32> to vector<2x8x1xf32>
    %269 = tpu.reciprocal %268 {approx = true} : vector<2x8x1xf32> -> vector<2x8x1xf32>
    %270 = vector.broadcast %269 : vector<2x8x1xf32> to vector<2x8x8xf32>
    %271 = arith.mulf %266, %270 : vector<2x8x8xf32>
    %272 = vector.extract_strided_slice %253 {offsets = [0, 0, 0], sizes = [2, 8, 8], strides = [1, 1, 1]} : vector<2x8x32xf32> to vector<2x8x8xf32>
    "tpu.trace_start"() <{level = 10 : i32, message = "bqk,bkd->bqd"}> : () -> ()
    %cst_114 = arith.constant dense<0.000000e+00> : vector<2x8x8xf32>
    %273 = tpu.matmul %271, %272, %cst_114 {dimension_numbers = #tpu.dot_dimension_numbers<[2], [1], [1], [2], [0, 0, 0, 1, 1, 2], [0], [0]>} : vector<2x8x8xf32>, vector<2x8x8xf32>, vector<2x8x8xf32> -> vector<2x8x8xf32>
    "tpu.trace_stop"() : () -> ()
    %274 = vector.extract_strided_slice %255 {offsets = [0, 0], sizes = [8, 32], strides = [1, 1]} : vector<32x32xf32> to vector<8x32xf32>
    "tpu.trace_start"() <{level = 10 : i32, message = "bsd,dh->bsh"}> : () -> ()
    %cst_115 = arith.constant dense<0.000000e+00> : vector<2x8x32xf32>
    %275 = tpu.matmul %273, %274, %cst_115 {dimension_numbers = #tpu.dot_dimension_numbers<[2], [0], [0, 1], [1], [0, 0, 0, 1, 1, 1], [], []>} : vector<2x8x8xf32>, vector<8x32xf32>, vector<2x8x32xf32> -> vector<2x8x32xf32>
    "tpu.trace_stop"() : () -> ()
    %276 = arith.addf %256, %275 : vector<2x8x32xf32>
    %277 = vector.extract_strided_slice %251 {offsets = [0, 0, 8], sizes = [2, 8, 8], strides = [1, 1, 1]} : vector<2x8x32xf32> to vector<2x8x8xf32>
    %278 = vector.extract_strided_slice %252 {offsets = [0, 0, 8], sizes = [2, 8, 8], strides = [1, 1, 1]} : vector<2x8x32xf32> to vector<2x8x8xf32>
    "tpu.trace_start"() <{level = 10 : i32, message = "bqd,bkd->bqk"}> : () -> ()
    %cst_116 = arith.constant dense<0.000000e+00> : vector<2x8x8xf32>
    %279 = tpu.matmul %277, %278, %cst_116 {dimension_numbers = #tpu.dot_dimension_numbers<[2], [2], [1], [1], [0, 0, 0, 1, 1, 1], [0], [0]>} : vector<2x8x8xf32>, vector<2x8x8xf32>, vector<2x8x8xf32> -> vector<2x8x8xf32>
    "tpu.trace_stop"() : () -> ()
    %280 = vector.broadcast %30 : vector<2x1x8xf32> to vector<2x8x8xf32>
    %281 = arith.addf %279, %280 : vector<2x8x8xf32>
    %cst_117 = arith.constant dense<0xFF800000> : vector<2x8xf32>
    %282 = vector.multi_reduction <maximumf>, %281, %cst_117 [2] : vector<2x8x8xf32> to vector<2x8xf32>
    %283 = vector.shape_cast %282 : vector<2x8xf32> to vector<2x8x1xf32>
    %284 = vector.broadcast %283 : vector<2x8x1xf32> to vector<2x8x8xf32>
    %285 = arith.subf %281, %284 : vector<2x8x8xf32>
    %286 = math.exp %285 : vector<2x8x8xf32>
    %cst_118 = arith.constant dense<0.000000e+00> : vector<2x8xf32>
    %287 = vector.multi_reduction <add>, %286, %cst_118 [2] : vector<2x8x8xf32> to vector<2x8xf32>
    %288 = vector.shape_cast %287 : vector<2x8xf32> to vector<2x8x1xf32>
    %289 = tpu.reciprocal %288 {approx = true} : vector<2x8x1xf32> -> vector<2x8x1xf32>
    %290 = vector.broadcast %289 : vector<2x8x1xf32> to vector<2x8x8xf32>
    %291 = arith.mulf %286, %290 : vector<2x8x8xf32>
    %292 = vector.extract_strided_slice %253 {offsets = [0, 0, 8], sizes = [2, 8, 8], strides = [1, 1, 1]} : vector<2x8x32xf32> to vector<2x8x8xf32>
    "tpu.trace_start"() <{level = 10 : i32, message = "bqk,bkd->bqd"}> : () -> ()
    %cst_119 = arith.constant dense<0.000000e+00> : vector<2x8x8xf32>
    %293 = tpu.matmul %291, %292, %cst_119 {dimension_numbers = #tpu.dot_dimension_numbers<[2], [1], [1], [2], [0, 0, 0, 1, 1, 2], [0], [0]>} : vector<2x8x8xf32>, vector<2x8x8xf32>, vector<2x8x8xf32> -> vector<2x8x8xf32>
    "tpu.trace_stop"() : () -> ()
    %294 = vector.extract_strided_slice %255 {offsets = [8, 0], sizes = [8, 32], strides = [1, 1]} : vector<32x32xf32> to vector<8x32xf32>
    "tpu.trace_start"() <{level = 10 : i32, message = "bsd,dh->bsh"}> : () -> ()
    %cst_120 = arith.constant dense<0.000000e+00> : vector<2x8x32xf32>
    %295 = tpu.matmul %293, %294, %cst_120 {dimension_numbers = #tpu.dot_dimension_numbers<[2], [0], [0, 1], [1], [0, 0, 0, 1, 1, 1], [], []>} : vector<2x8x8xf32>, vector<8x32xf32>, vector<2x8x32xf32> -> vector<2x8x32xf32>
    "tpu.trace_stop"() : () -> ()
    %296 = arith.addf %276, %295 : vector<2x8x32xf32>
    %297 = vector.extract_strided_slice %251 {offsets = [0, 0, 16], sizes = [2, 8, 8], strides = [1, 1, 1]} : vector<2x8x32xf32> to vector<2x8x8xf32>
    %298 = vector.extract_strided_slice %252 {offsets = [0, 0, 16], sizes = [2, 8, 8], strides = [1, 1, 1]} : vector<2x8x32xf32> to vector<2x8x8xf32>
    "tpu.trace_start"() <{level = 10 : i32, message = "bqd,bkd->bqk"}> : () -> ()
    %cst_121 = arith.constant dense<0.000000e+00> : vector<2x8x8xf32>
    %299 = tpu.matmul %297, %298, %cst_121 {dimension_numbers = #tpu.dot_dimension_numbers<[2], [2], [1], [1], [0, 0, 0, 1, 1, 1], [0], [0]>} : vector<2x8x8xf32>, vector<2x8x8xf32>, vector<2x8x8xf32> -> vector<2x8x8xf32>
    "tpu.trace_stop"() : () -> ()
    %300 = vector.broadcast %30 : vector<2x1x8xf32> to vector<2x8x8xf32>
    %301 = arith.addf %299, %300 : vector<2x8x8xf32>
    %cst_122 = arith.constant dense<0xFF800000> : vector<2x8xf32>
    %302 = vector.multi_reduction <maximumf>, %301, %cst_122 [2] : vector<2x8x8xf32> to vector<2x8xf32>
    %303 = vector.shape_cast %302 : vector<2x8xf32> to vector<2x8x1xf32>
    %304 = vector.broadcast %303 : vector<2x8x1xf32> to vector<2x8x8xf32>
    %305 = arith.subf %301, %304 : vector<2x8x8xf32>
    %306 = math.exp %305 : vector<2x8x8xf32>
    %cst_123 = arith.constant dense<0.000000e+00> : vector<2x8xf32>
    %307 = vector.multi_reduction <add>, %306, %cst_123 [2] : vector<2x8x8xf32> to vector<2x8xf32>
    %308 = vector.shape_cast %307 : vector<2x8xf32> to vector<2x8x1xf32>
    %309 = tpu.reciprocal %308 {approx = true} : vector<2x8x1xf32> -> vector<2x8x1xf32>
    %310 = vector.broadcast %309 : vector<2x8x1xf32> to vector<2x8x8xf32>
    %311 = arith.mulf %306, %310 : vector<2x8x8xf32>
    %312 = vector.extract_strided_slice %253 {offsets = [0, 0, 16], sizes = [2, 8, 8], strides = [1, 1, 1]} : vector<2x8x32xf32> to vector<2x8x8xf32>
    "tpu.trace_start"() <{level = 10 : i32, message = "bqk,bkd->bqd"}> : () -> ()
    %cst_124 = arith.constant dense<0.000000e+00> : vector<2x8x8xf32>
    %313 = tpu.matmul %311, %312, %cst_124 {dimension_numbers = #tpu.dot_dimension_numbers<[2], [1], [1], [2], [0, 0, 0, 1, 1, 2], [0], [0]>} : vector<2x8x8xf32>, vector<2x8x8xf32>, vector<2x8x8xf32> -> vector<2x8x8xf32>
    "tpu.trace_stop"() : () -> ()
    %314 = vector.extract_strided_slice %255 {offsets = [16, 0], sizes = [8, 32], strides = [1, 1]} : vector<32x32xf32> to vector<8x32xf32>
    "tpu.trace_start"() <{level = 10 : i32, message = "bsd,dh->bsh"}> : () -> ()
    %cst_125 = arith.constant dense<0.000000e+00> : vector<2x8x32xf32>
    %315 = tpu.matmul %313, %314, %cst_125 {dimension_numbers = #tpu.dot_dimension_numbers<[2], [0], [0, 1], [1], [0, 0, 0, 1, 1, 1], [], []>} : vector<2x8x8xf32>, vector<8x32xf32>, vector<2x8x32xf32> -> vector<2x8x32xf32>
    "tpu.trace_stop"() : () -> ()
    %316 = arith.addf %296, %315 : vector<2x8x32xf32>
    %317 = vector.extract_strided_slice %251 {offsets = [0, 0, 24], sizes = [2, 8, 8], strides = [1, 1, 1]} : vector<2x8x32xf32> to vector<2x8x8xf32>
    %318 = vector.extract_strided_slice %252 {offsets = [0, 0, 24], sizes = [2, 8, 8], strides = [1, 1, 1]} : vector<2x8x32xf32> to vector<2x8x8xf32>
    "tpu.trace_start"() <{level = 10 : i32, message = "bqd,bkd->bqk"}> : () -> ()
    %cst_126 = arith.constant dense<0.000000e+00> : vector<2x8x8xf32>
    %319 = tpu.matmul %317, %318, %cst_126 {dimension_numbers = #tpu.dot_dimension_numbers<[2], [2], [1], [1], [0, 0, 0, 1, 1, 1], [0], [0]>} : vector<2x8x8xf32>, vector<2x8x8xf32>, vector<2x8x8xf32> -> vector<2x8x8xf32>
    "tpu.trace_stop"() : () -> ()
    %320 = vector.broadcast %30 : vector<2x1x8xf32> to vector<2x8x8xf32>
    %321 = arith.addf %319, %320 : vector<2x8x8xf32>
    %cst_127 = arith.constant dense<0xFF800000> : vector<2x8xf32>
    %322 = vector.multi_reduction <maximumf>, %321, %cst_127 [2] : vector<2x8x8xf32> to vector<2x8xf32>
    %323 = vector.shape_cast %322 : vector<2x8xf32> to vector<2x8x1xf32>
    %324 = vector.broadcast %323 : vector<2x8x1xf32> to vector<2x8x8xf32>
    %325 = arith.subf %321, %324 : vector<2x8x8xf32>
    %326 = math.exp %325 : vector<2x8x8xf32>
    %cst_128 = arith.constant dense<0.000000e+00> : vector<2x8xf32>
    %327 = vector.multi_reduction <add>, %326, %cst_128 [2] : vector<2x8x8xf32> to vector<2x8xf32>
    %328 = vector.shape_cast %327 : vector<2x8xf32> to vector<2x8x1xf32>
    %329 = tpu.reciprocal %328 {approx = true} : vector<2x8x1xf32> -> vector<2x8x1xf32>
    %330 = vector.broadcast %329 : vector<2x8x1xf32> to vector<2x8x8xf32>
    %331 = arith.mulf %326, %330 : vector<2x8x8xf32>
    %332 = vector.extract_strided_slice %253 {offsets = [0, 0, 24], sizes = [2, 8, 8], strides = [1, 1, 1]} : vector<2x8x32xf32> to vector<2x8x8xf32>
    "tpu.trace_start"() <{level = 10 : i32, message = "bqk,bkd->bqd"}> : () -> ()
    %cst_129 = arith.constant dense<0.000000e+00> : vector<2x8x8xf32>
    %333 = tpu.matmul %331, %332, %cst_129 {dimension_numbers = #tpu.dot_dimension_numbers<[2], [1], [1], [2], [0, 0, 0, 1, 1, 2], [0], [0]>} : vector<2x8x8xf32>, vector<2x8x8xf32>, vector<2x8x8xf32> -> vector<2x8x8xf32>
    "tpu.trace_stop"() : () -> ()
    %334 = vector.extract_strided_slice %255 {offsets = [24, 0], sizes = [8, 32], strides = [1, 1]} : vector<32x32xf32> to vector<8x32xf32>
    "tpu.trace_start"() <{level = 10 : i32, message = "bsd,dh->bsh"}> : () -> ()
    %cst_130 = arith.constant dense<0.000000e+00> : vector<2x8x32xf32>
    %335 = tpu.matmul %333, %334, %cst_130 {dimension_numbers = #tpu.dot_dimension_numbers<[2], [0], [0, 1], [1], [0, 0, 0, 1, 1, 1], [], []>} : vector<2x8x8xf32>, vector<8x32xf32>, vector<2x8x32xf32> -> vector<2x8x32xf32>
    "tpu.trace_stop"() : () -> ()
    %336 = arith.addf %316, %335 : vector<2x8x32xf32>
    %337 = vector.shape_cast %336 : vector<2x8x32xf32> to vector<16x32xf32>
    %c1_131 = arith.constant 1 : index
    %c0_132 = arith.constant 0 : index
    %c0_133 = arith.constant 0 : index
    %338 = vector.load %arg8[%c1_131, %c0_132, %c0_133] : memref<2x1x32xf32, #tpu.memory_space<vmem>>, vector<1x1x32xf32>
    %339 = vector.shape_cast %338 : vector<1x1x32xf32> to vector<1x32xf32>
    %340 = vector.broadcast %339 : vector<1x32xf32> to vector<16x32xf32>
    %341 = arith.addf %337, %340 : vector<16x32xf32>
    %342 = arith.addf %240, %341 : vector<16x32xf32>
    %c1_134 = arith.constant 1 : index
    %c0_135 = arith.constant 0 : index
    %c0_136 = arith.constant 0 : index
    %343 = vector.load %arg9[%c1_134, %c0_135, %c0_136] : memref<2x1x32xf32, #tpu.memory_space<vmem>>, vector<1x1x32xf32>
    %344 = vector.shape_cast %343 : vector<1x1x32xf32> to vector<1x32xf32>
    %c1_137 = arith.constant 1 : index
    %c0_138 = arith.constant 0 : index
    %c0_139 = arith.constant 0 : index
    %345 = vector.load %arg10[%c1_137, %c0_138, %c0_139] : memref<2x1x32xf32, #tpu.memory_space<vmem>>, vector<1x1x32xf32>
    %346 = vector.shape_cast %345 : vector<1x1x32xf32> to vector<1x32xf32>
    %cst_140 = arith.constant dense<0.000000e+00> : vector<16xf32>
    %347 = vector.multi_reduction <add>, %342, %cst_140 [1] : vector<16x32xf32> to vector<16xf32>
    %348 = vector.shape_cast %347 : vector<16xf32> to vector<16x1xf32>
    %cst_141 = arith.constant 3.200000e+01 : f32
    %349 = vector.broadcast %cst_141 : f32 to vector<16x1xf32>
    %350 = arith.divf %348, %349 : vector<16x1xf32>
    %351 = vector.broadcast %350 : vector<16x1xf32> to vector<16x32xf32>
    %352 = arith.subf %342, %351 : vector<16x32xf32>
    %353 = arith.mulf %352, %352 : vector<16x32xf32>
    %cst_142 = arith.constant dense<0.000000e+00> : vector<16xf32>
    %354 = vector.multi_reduction <add>, %353, %cst_142 [1] : vector<16x32xf32> to vector<16xf32>
    %355 = vector.shape_cast %354 : vector<16xf32> to vector<16x1xf32>
    %cst_143 = arith.constant 3.200000e+01 : f32
    %356 = vector.broadcast %cst_143 : f32 to vector<16x1xf32>
    %357 = arith.divf %355, %356 : vector<16x1xf32>
    %358 = vector.broadcast %350 : vector<16x1xf32> to vector<16x32xf32>
    %359 = arith.subf %342, %358 : vector<16x32xf32>
    %cst_144 = arith.constant 9.99999996E-13 : f32
    %360 = vector.broadcast %cst_144 : f32 to vector<16x1xf32>
    %361 = arith.addf %357, %360 : vector<16x1xf32>
    %362 = math.rsqrt %361 : vector<16x1xf32>
    %363 = vector.broadcast %362 : vector<16x1xf32> to vector<16x32xf32>
    %364 = arith.mulf %359, %363 : vector<16x32xf32>
    %365 = vector.broadcast %344 : vector<1x32xf32> to vector<16x32xf32>
    %366 = arith.mulf %364, %365 : vector<16x32xf32>
    %367 = vector.broadcast %346 : vector<1x32xf32> to vector<16x32xf32>
    %368 = arith.addf %366, %367 : vector<16x32xf32>
    %c1_145 = arith.constant 1 : index
    %c0_146 = arith.constant 0 : index
    %c0_147 = arith.constant 0 : index
    %369 = vector.load %arg11[%c1_145, %c0_146, %c0_147] : memref<2x32x64xf32, #tpu.memory_space<vmem>>, vector<1x32x64xf32>
    %370 = vector.shape_cast %369 : vector<1x32x64xf32> to vector<32x64xf32>
    %cst_148 = arith.constant dense<0.000000e+00> : vector<16x64xf32>
    %371 = tpu.matmul %368, %370, %cst_148 {dimension_numbers = #tpu.dot_dimension_numbers<[1], [0], [0], [1], [0, 0, 1, 1], [], []>} : vector<16x32xf32>, vector<32x64xf32>, vector<16x64xf32> -> vector<16x64xf32>
    %c1_149 = arith.constant 1 : index
    %c0_150 = arith.constant 0 : index
    %c0_151 = arith.constant 0 : index
    %372 = vector.load %arg12[%c1_149, %c0_150, %c0_151] : memref<2x1x64xf32, #tpu.memory_space<vmem>>, vector<1x1x64xf32>
    %373 = vector.shape_cast %372 : vector<1x1x64xf32> to vector<1x64xf32>
    %374 = vector.broadcast %373 : vector<1x64xf32> to vector<16x64xf32>
    %375 = arith.addf %371, %374 : vector<16x64xf32>
    %cst_152 = arith.constant 5.000000e-01 : f32
    %376 = vector.broadcast %cst_152 : f32 to vector<16x64xf32>
    %377 = arith.mulf %376, %375 : vector<16x64xf32>
    %cst_153 = arith.constant 0.707106769 : f32
    %378 = vector.broadcast %cst_153 : f32 to vector<16x64xf32>
    %379 = arith.mulf %375, %378 : vector<16x64xf32>
    %cst_154 = arith.constant 0.000000e+00 : f32
    %380 = vector.broadcast %cst_154 : f32 to vector<16x64xf32>
    %381 = arith.cmpf oge, %379, %380 : vector<16x64xf32>
    %cst_155 = arith.constant 1.000000e+00 : f32
    %cst_156 = arith.constant -1.000000e+00 : f32
    %382 = vector.broadcast %cst_155 : f32 to vector<16x64xf32>
    %383 = vector.broadcast %cst_156 : f32 to vector<16x64xf32>
    %384 = arith.select %381, %382, %383 : vector<16x64xi1>, vector<16x64xf32>
    %385 = math.absf %379 : vector<16x64xf32>
    %cst_157 = arith.constant 0.327591091 : f32
    %386 = vector.broadcast %cst_157 : f32 to vector<16x64xf32>
    %387 = arith.mulf %386, %385 : vector<16x64xf32>
    %cst_158 = arith.constant 1.000000e+00 : f32
    %388 = vector.broadcast %cst_158 : f32 to vector<16x64xf32>
    %389 = arith.addf %388, %387 : vector<16x64xf32>
    %cst_159 = arith.constant 1.000000e+00 : f32
    %390 = vector.broadcast %cst_159 : f32 to vector<16x64xf32>
    %391 = arith.divf %390, %389 : vector<16x64xf32>
    %cst_160 = arith.constant 1.06140542 : f32
    %392 = vector.broadcast %cst_160 : f32 to vector<16x64xf32>
    %393 = arith.mulf %392, %391 : vector<16x64xf32>
    %cst_161 = arith.constant -1.45315206 : f32
    %394 = vector.broadcast %cst_161 : f32 to vector<16x64xf32>
    %395 = arith.addf %393, %394 : vector<16x64xf32>
    %396 = arith.mulf %395, %391 : vector<16x64xf32>
    %cst_162 = arith.constant 1.42141378 : f32
    %397 = vector.broadcast %cst_162 : f32 to vector<16x64xf32>
    %398 = arith.addf %396, %397 : vector<16x64xf32>
    %399 = arith.mulf %398, %391 : vector<16x64xf32>
    %cst_163 = arith.constant -0.284496725 : f32
    %400 = vector.broadcast %cst_163 : f32 to vector<16x64xf32>
    %401 = arith.addf %399, %400 : vector<16x64xf32>
    %402 = arith.mulf %401, %391 : vector<16x64xf32>
    %cst_164 = arith.constant 0.254829586 : f32
    %403 = vector.broadcast %cst_164 : f32 to vector<16x64xf32>
    %404 = arith.addf %402, %403 : vector<16x64xf32>
    %405 = arith.mulf %404, %391 : vector<16x64xf32>
    %cst_165 = arith.constant 0.000000e+00 : f32
    %406 = vector.broadcast %cst_165 : f32 to vector<16x64xf32>
    %407 = arith.subf %406, %385 : vector<16x64xf32>
    %408 = arith.mulf %407, %385 : vector<16x64xf32>
    %409 = math.exp %408 : vector<16x64xf32>
    %410 = arith.mulf %405, %409 : vector<16x64xf32>
    %cst_166 = arith.constant 1.000000e+00 : f32
    %411 = vector.broadcast %cst_166 : f32 to vector<16x64xf32>
    %412 = arith.subf %411, %410 : vector<16x64xf32>
    %413 = arith.mulf %384, %412 : vector<16x64xf32>
    %cst_167 = arith.constant 1.000000e+00 : f32
    %414 = vector.broadcast %cst_167 : f32 to vector<16x64xf32>
    %415 = arith.addf %414, %413 : vector<16x64xf32>
    %416 = arith.mulf %377, %415 : vector<16x64xf32>
    %c1_168 = arith.constant 1 : index
    %c0_169 = arith.constant 0 : index
    %c0_170 = arith.constant 0 : index
    %417 = vector.load %arg13[%c1_168, %c0_169, %c0_170] : memref<2x64x32xf32, #tpu.memory_space<vmem>>, vector<1x64x32xf32>
    %418 = vector.shape_cast %417 : vector<1x64x32xf32> to vector<64x32xf32>
    %cst_171 = arith.constant dense<0.000000e+00> : vector<16x32xf32>
    %419 = tpu.matmul %416, %418, %cst_171 {dimension_numbers = #tpu.dot_dimension_numbers<[1], [0], [0], [1], [0, 0, 1, 1], [], []>} : vector<16x64xf32>, vector<64x32xf32>, vector<16x32xf32> -> vector<16x32xf32>
    %c1_172 = arith.constant 1 : index
    %c0_173 = arith.constant 0 : index
    %c0_174 = arith.constant 0 : index
    %420 = vector.load %arg14[%c1_172, %c0_173, %c0_174] : memref<2x1x32xf32, #tpu.memory_space<vmem>>, vector<1x1x32xf32>
    %421 = vector.shape_cast %420 : vector<1x1x32xf32> to vector<1x32xf32>
    %422 = vector.broadcast %421 : vector<1x32xf32> to vector<16x32xf32>
    %423 = arith.addf %419, %422 : vector<16x32xf32>
    %424 = arith.addf %368, %423 : vector<16x32xf32>
    %c1_175 = arith.constant 1 : index
    %c0_176 = arith.constant 0 : index
    %c0_177 = arith.constant 0 : index
    %425 = vector.load %arg15[%c1_175, %c0_176, %c0_177] : memref<2x1x32xf32, #tpu.memory_space<vmem>>, vector<1x1x32xf32>
    %426 = vector.shape_cast %425 : vector<1x1x32xf32> to vector<1x32xf32>
    %c1_178 = arith.constant 1 : index
    %c0_179 = arith.constant 0 : index
    %c0_180 = arith.constant 0 : index
    %427 = vector.load %arg16[%c1_178, %c0_179, %c0_180] : memref<2x1x32xf32, #tpu.memory_space<vmem>>, vector<1x1x32xf32>
    %428 = vector.shape_cast %427 : vector<1x1x32xf32> to vector<1x32xf32>
    %cst_181 = arith.constant dense<0.000000e+00> : vector<16xf32>
    %429 = vector.multi_reduction <add>, %424, %cst_181 [1] : vector<16x32xf32> to vector<16xf32>
    %430 = vector.shape_cast %429 : vector<16xf32> to vector<16x1xf32>
    %cst_182 = arith.constant 3.200000e+01 : f32
    %431 = vector.broadcast %cst_182 : f32 to vector<16x1xf32>
    %432 = arith.divf %430, %431 : vector<16x1xf32>
    %433 = vector.broadcast %432 : vector<16x1xf32> to vector<16x32xf32>
    %434 = arith.subf %424, %433 : vector<16x32xf32>
    %435 = arith.mulf %434, %434 : vector<16x32xf32>
    %cst_183 = arith.constant dense<0.000000e+00> : vector<16xf32>
    %436 = vector.multi_reduction <add>, %435, %cst_183 [1] : vector<16x32xf32> to vector<16xf32>
    %437 = vector.shape_cast %436 : vector<16xf32> to vector<16x1xf32>
    %cst_184 = arith.constant 3.200000e+01 : f32
    %438 = vector.broadcast %cst_184 : f32 to vector<16x1xf32>
    %439 = arith.divf %437, %438 : vector<16x1xf32>
    %440 = vector.broadcast %432 : vector<16x1xf32> to vector<16x32xf32>
    %441 = arith.subf %424, %440 : vector<16x32xf32>
    %cst_185 = arith.constant 9.99999996E-13 : f32
    %442 = vector.broadcast %cst_185 : f32 to vector<16x1xf32>
    %443 = arith.addf %439, %442 : vector<16x1xf32>
    %444 = math.rsqrt %443 : vector<16x1xf32>
    %445 = vector.broadcast %444 : vector<16x1xf32> to vector<16x32xf32>
    %446 = arith.mulf %441, %445 : vector<16x32xf32>
    %447 = vector.broadcast %426 : vector<1x32xf32> to vector<16x32xf32>
    %448 = arith.mulf %446, %447 : vector<16x32xf32>
    %449 = vector.broadcast %428 : vector<1x32xf32> to vector<16x32xf32>
    %450 = arith.addf %448, %449 : vector<16x32xf32>
    %451 = vector.shape_cast %450 : vector<16x32xf32> to vector<2x8x32xf32>
    %cst_186 = arith.constant dense<0.000000e+00> : vector<2x32xf32>
    %452 = vector.multi_reduction <add>, %451, %cst_186 [1] : vector<2x8x32xf32> to vector<2x32xf32>
    %cst_187 = arith.constant 8.000000e+00 : f32
    %453 = vector.broadcast %cst_187 : f32 to vector<2x32xf32>
    %454 = arith.divf %452, %453 : vector<2x32xf32>
    %c0_188 = arith.constant 0 : index
    %c0_189 = arith.constant 0 : index
    %455 = vector.load %arg17[%c0_188, %c0_189] : memref<32x128xf32, #tpu.memory_space<vmem>>, vector<32x128xf32>
    %cst_190 = arith.constant dense<0.000000e+00> : vector<2x128xf32>
    %456 = tpu.matmul %454, %455, %cst_190 {dimension_numbers = #tpu.dot_dimension_numbers<[1], [0], [0], [1], [0, 0, 1, 1], [], []>} : vector<2x32xf32>, vector<32x128xf32>, vector<2x128xf32> -> vector<2x128xf32>
    %c0_191 = arith.constant 0 : index
    %c0_192 = arith.constant 0 : index
    %457 = vector.load %arg18[%c0_191, %c0_192] : memref<1x128xf32, #tpu.memory_space<vmem>>, vector<1x128xf32>
    %458 = vector.broadcast %457 : vector<1x128xf32> to vector<2x128xf32>
    %459 = arith.addf %456, %458 : vector<2x128xf32>
    %c0_193 = arith.constant 0 : index
    %c0_194 = arith.constant 0 : index
    %460 = vector.load %arg19[%c0_193, %c0_194] : memref<2x128xf32, #tpu.memory_space<vmem>>, vector<2x128xf32>
    tpu.vector_store %arg19[%c0_193, %c0_194], %459 {strides = array<i32>} : memref<2x128xf32, #tpu.memory_space<vmem>>, vector<2x128xf32>,
    return
  }
  func.func @transform_0(%arg0: i32) -> (i32, i32) {
    %c0_i32 = arith.constant 0 : i32
    %c0_i32_0 = arith.constant 0 : i32
    %c0_i32_1 = arith.constant 0 : i32
    return %c0_i32, %c0_i32_0 : i32, i32
  }
  func.func @transform_1(%arg0: i32) -> (i32, i32) {
    %c0_i32 = arith.constant 0 : i32
    %c0_i32_0 = arith.constant 0 : i32
    %c0_i32_1 = arith.constant 0 : i32
    return %c0_i32, %c0_i32_0 : i32, i32
  }
  func.func @transform_2(%arg0: i32) -> (i32, i32) {
    %c0_i32 = arith.constant 0 : i32
    %c0_i32_0 = arith.constant 0 : i32
    %c0_i32_1 = arith.constant 0 : i32
    return %c0_i32, %c0_i32_0 : i32, i32
  }
  func.func @transform_3(%arg0: i32) -> (i32, i32) {
    %c0_i32 = arith.constant 0 : i32
    %c0_i32_0 = arith.constant 0 : i32
    %c0_i32_1 = arith.constant 0 : i32
    return %c0_i32, %c0_i32_0 : i32, i32
  }
  func.func @transform_4(%arg0: i32) -> (i32, i32, i32) {
    %c0_i32 = arith.constant 0 : i32
    %c0_i32_0 = arith.constant 0 : i32
    %c0_i32_1 = arith.constant 0 : i32
    %c0_i32_2 = arith.constant 0 : i32
    return %c0_i32, %c0_i32_0, %c0_i32_1 : i32, i32, i32
  }
  func.func @transform_5(%arg0: i32) -> (i32, i32, i32) {
    %c0_i32 = arith.constant 0 : i32
    %c0_i32_0 = arith.constant 0 : i32
    %c0_i32_1 = arith.constant 0 : i32
    %c0_i32_2 = arith.constant 0 : i32
    return %c0_i32, %c0_i32_0, %c0_i32_1 : i32, i32, i32
  }
  func.func @transform_6(%arg0: i32) -> (i32, i32, i32) {
    %c0_i32 = arith.constant 0 : i32
    %c0_i32_0 = arith.constant 0 : i32
    %c0_i32_1 = arith.constant 0 : i32
    %c0_i32_2 = arith.constant 0 : i32
    return %c0_i32, %c0_i32_0, %c0_i32_1 : i32, i32, i32
  }
  func.func @transform_7(%arg0: i32) -> (i32, i32, i32) {
    %c0_i32 = arith.constant 0 : i32
    %c0_i32_0 = arith.constant 0 : i32
    %c0_i32_1 = arith.constant 0 : i32
    %c0_i32_2 = arith.constant 0 : i32
    return %c0_i32, %c0_i32_0, %c0_i32_1 : i32, i32, i32
  }
  func.func @transform_8(%arg0: i32) -> (i32, i32, i32) {
    %c0_i32 = arith.constant 0 : i32
    %c0_i32_0 = arith.constant 0 : i32
    %c0_i32_1 = arith.constant 0 : i32
    %c0_i32_2 = arith.constant 0 : i32
    return %c0_i32, %c0_i32_0, %c0_i32_1 : i32, i32, i32
  }
  func.func @transform_9(%arg0: i32) -> (i32, i32, i32) {
    %c0_i32 = arith.constant 0 : i32
    %c0_i32_0 = arith.constant 0 : i32
    %c0_i32_1 = arith.constant 0 : i32
    %c0_i32_2 = arith.constant 0 : i32
    return %c0_i32, %c0_i32_0, %c0_i32_1 : i32, i32, i32
  }
  func.func @transform_10(%arg0: i32) -> (i32, i32, i32) {
    %c0_i32 = arith.constant 0 : i32
    %c0_i32_0 = arith.constant 0 : i32
    %c0_i32_1 = arith.constant 0 : i32
    %c0_i32_2 = arith.constant 0 : i32
    return %c0_i32, %c0_i32_0, %c0_i32_1 : i32, i32, i32
  }
  func.func @transform_11(%arg0: i32) -> (i32, i32, i32) {
    %c0_i32 = arith.constant 0 : i32
    %c0_i32_0 = arith.constant 0 : i32
    %c0_i32_1 = arith.constant 0 : i32
    %c0_i32_2 = arith.constant 0 : i32
    return %c0_i32, %c0_i32_0, %c0_i32_1 : i32, i32, i32
  }
  func.func @transform_12(%arg0: i32) -> (i32, i32, i32) {
    %c0_i32 = arith.constant 0 : i32
    %c0_i32_0 = arith.constant 0 : i32
    %c0_i32_1 = arith.constant 0 : i32
    %c0_i32_2 = arith.constant 0 : i32
    return %c0_i32, %c0_i32_0, %c0_i32_1 : i32, i32, i32
  }
  func.func @transform_13(%arg0: i32) -> (i32, i32, i32) {
    %c0_i32 = arith.constant 0 : i32
    %c0_i32_0 = arith.constant 0 : i32
    %c0_i32_1 = arith.constant 0 : i32
    %c0_i32_2 = arith.constant 0 : i32
    return %c0_i32, %c0_i32_0, %c0_i32_1 : i32, i32, i32
  }
  func.func @transform_14(%arg0: i32) -> (i32, i32, i32) {
    %c0_i32 = arith.constant 0 : i32
    %c0_i32_0 = arith.constant 0 : i32
    %c0_i32_1 = arith.constant 0 : i32
    %c0_i32_2 = arith.constant 0 : i32
    return %c0_i32, %c0_i32_0, %c0_i32_1 : i32, i32, i32
  }
  func.func @transform_15(%arg0: i32) -> (i32, i32, i32) {
    %c0_i32 = arith.constant 0 : i32
    %c0_i32_0 = arith.constant 0 : i32
    %c0_i32_1 = arith.constant 0 : i32
    %c0_i32_2 = arith.constant 0 : i32
    return %c0_i32, %c0_i32_0, %c0_i32_1 : i32, i32, i32
  }
  func.func @transform_16(%arg0: i32) -> (i32, i32) {
    %c0_i32 = arith.constant 0 : i32
    %c0_i32_0 = arith.constant 0 : i32
    %c0_i32_1 = arith.constant 0 : i32
    return %c0_i32, %c0_i32_0 : i32, i32
  }
  func.func @transform_17(%arg0: i32) -> (i32, i32) {
    %c0_i32 = arith.constant 0 : i32
    %c0_i32_0 = arith.constant 0 : i32
    %c0_i32_1 = arith.constant 0 : i32
    return %c0_i32, %c0_i32_0 : i32, i32
  }
  func.func @transform_18(%arg0: i32) -> (i32, i32) {
    %c0_i32 = arith.constant 0 : i32
    %c0_i32_0 = arith.constant 0 : i32
    %c0_i32_1 = arith.constant 0 : i32
    return %c0_i32, %c0_i32_0 : i32, i32
  }
}

</mosaic_0001>

<bundles_post_ra>
// kernel: forward.1
= control target key start
LH: loop header
LB: loop body
LE: loop exit
PB: predicated region body
PF: predicated region fallthrough
CT: control target
= control target key end

     0   :  { %vm63_vm0 = vcmask 261120   ;;  %v5196_v36 = vmov 0.0   ;;  %vm5197_vm1 = vmmov 0   ;;  %s5198_s19 = smov 96   ;;  %vm244_vm2 = vcmask 64512   ;;  %s5201_s22 = smov 88   ;;  %s5917_s0 = inlined_call_operand.vmem [shape: f32[16,32], index: 0, kind: input, shape index: {}]   ;;  %s5918_s4 = inlined_call_operand.vmem [shape: f32[2,32,96], index: 4, kind: input, shape index: {}]   ;;  %s5919_s2 = inlined_call_operand.vmem [shape: f32[1,32], index: 2, kind: input, shape index: {}]   ;;  %s5920_s3 = inlined_call_operand.vmem [shape: f32[1,32], index: 3, kind: input, shape index: {}]   ;;  %s5921_s5 = inlined_call_operand.vmem [shape: f32[2,1,96], index: 5, kind: input, shape index: {}]   ;;  %s5922_s1 = inlined_call_operand.vmem [shape: f32[2,8], index: 1, kind: input, shape index: {}]   ;;  %s5923_s6 = inlined_call_operand.vmem [shape: f32[2,32,32], index: 6, kind: input, shape index: {}]   ;;  %s5924_s7 = inlined_call_operand.vmem [shape: f32[2,1,32], index: 7, kind: input, shape index: {}]   ;;  %s5925_s10 = inlined_call_operand.vmem [shape: f32[2,32,64], index: 10, kind: input, shape index: {}]   ;;  %s5926_s8 = inlined_call_operand.vmem [shape: f32[2,1,32], index: 8, kind: input, shape index: {}]   ;;  %s5927_s9 = inlined_call_operand.vmem [shape: f32[2,1,32], index: 9, kind: input, shape index: {}]   ;;  %s5928_s12 = inlined_call_operand.vmem [shape: f32[2,64,32], index: 12, kind: input, shape index: {}]   ;;  %s5929_s11 = inlined_call_operand.vmem [shape: f32[2,1,64], index: 11, kind: input, shape index: {}]   ;;  %s5930_s13 = inlined_call_operand.vmem [shape: f32[2,1,32], index: 13, kind: input, shape index: {}]   ;;  %s5931_s14 = inlined_call_operand.vmem [shape: f32[2,1,32], index: 14, kind: input, shape index: {}]   ;;  %s5932_s15 = inlined_call_operand.vmem [shape: f32[2,1,32], index: 15, kind: input, shape index: {}]   ;;  %s5933_s16 = inlined_call_operand.vmem [shape: f32[32,128], index: 16, kind: input, shape index: {}]   ;;  %s5934_s17 = inlined_call_operand.vmem [shape: f32[1,128], index: 17, kind: input, shape index: {}]   ;;  %s5935_s18 = inlined_call_operand.vmem [shape: f32[2,128], index: 18, kind: output, shape index: {}]  }
   0x1   :  { %5944 = sst [smem:[#allocation2_spill]] %s5917_s0  ;;  %v4445_v29 = vld [vmem:[%s5920_s3] ss:$0 sm:$0xff]  ;;  %4716 = vmatprep.subr.mxu1 %v5196_v36  ;;  %4718 = vmatprep.mubr.msk.f32.mxu1 %vm5197_vm1, %v5196_v36  ;;  %v5199_v46 = vmov 1966171168   ;;  %v114_v48 = vlaneseq  ;;  %s5203_s23 = smov 80  }
   0x2   :  { %5945 = sst [smem:[#allocation3_spill]] %s5918_s4  ;;  %s5947_s29 = sld [smem:[#allocation2_spill]]  ;;  %v4446_v37 = vld [vmem:[%s5921_s5] ss:$0 sm:$0xff]  ;;  %v112_v47 = vunpack.c.l.s4 %v5199_v46  ;;  %vm2106_vm5 = vcmask 523264   ;;  %vm4365_vm8 = vcmask 1041409  }
   0x3   :  { %5946 = sst [smem:[#allocation4_spill]] %s5919_s2  ;;  %s5948_s20 = sld [smem:[#allocation3_spill]]  ;;  %v107_v49 = vld [vmem:[%s5922_s1] sm:$0x3]  ;;  %v115_v52 = vshrl.u32 %v114_v48, 7 }
   0x4   :  { %s5949_s28 = sld [smem:[#allocation4_spill]]  ;;  %v108_v50 = vsub.f32 1.0, %v107_v49  ;;  %v113_v51 = vunpack.c.0.s8 %v112_v47  ;;  %s5200_s1 = smov 64  }
   0x5   :  { %v233_v57 = vsub.s32 0, %v115_v52  ;;  %s5202_s2 = smov 120   ;;  %s5204_s24 = smov 56  }
   0x6   :  { %v109_v53 = vmul.f32 -1e+09, %v108_v50  ;;  %v116_v54 = vsub.s32 %v113_v51, %v115_v52  ;;  %s5205_s25 = smov 112   ;;  %s5206_s26 = smov 48  }
   0x7   :  { %s5942_s27 = smov 72  }
   0x8   :  { %v59_v0 = vld [vmem:[%s5947_s29] sm:$0xff]  ;;  %v60_v1 = vld [vmem:[%s5947_s29 + $0x8] sm:$0xff]  ;;  %v117_v55 = vrot.slane %v109_v53, %v116_v54  ;;  %s5938_s29 = smov 40  }
   0x9   :  { %v64_v2 = vsel %vm63_vm0, %v59_v0, 0.0  ;;  %v67_v3 = vsel %vm63_vm0, %v60_v1, 0.0  ;;  %v133_v14 = vld [vmem:[%s5948_s20] sm:$0xff]  ;;  %v134_v15 = vld [vmem:[%s5948_s20 + $0x8] sm:$0xff]  ;;  %v135_v16 = vld [vmem:[%s5948_s20 + $0x10] sm:$0xff] }
   0xa   :  { %65 = vadd.xlane.f32.xlu0 %v64_v2  ;;  %v4998_v17 = vpack.c.bf16 %v134_v15, %v133_v14  ;;  %v136_v18 = vld [vmem:[%s5948_s20 + $0x18] sm:$0xff]  ;;  %v4444_v27 = vld [vmem:[%s5949_s28] ss:$0 sm:$0xff]  ;;  %v125_v56 = vrot.slane %v117_v55, %v116_v54  ;;  %v118_v58 = vcombine.high %v117_v55, %v117_v55  ;;  %s5940_s28 = smov 104  }
   0xb   :  { %v5002_v19 = vpack.c.bf16 %v136_v18, %v135_v16 }
   0xc   :  { %4999 = vmatprep.subr.bf16.mxu0 %v4998_v17  ;;  %v5381_v59 = vrot.slane %v125_v56, %v233_v57  ;;  %v132_v60 = vrot.slane %v118_v58, %v116_v54 }
   0xd   :  { %5001 = vmatpush3.bf16.msra.mxu0 %v4998_v17 }
   0xe   :  { %68 = vadd.xlane.f32.xlu0 %v67_v3  ;;  %5003 = vmatprep.subr.bf16.mxu0 %v5002_v19 }
  0x11   :  { %5005 = vmatpush3.bf16.msra.mxu0 %v5002_v19 }
  0x12   :  { %4736 = vmatprep.subr.mxu0 %v5196_v36 }
  0x97   :  { %v66_v4 = vpop.xlane.xlu0 %65 }
  0x98   :  { %v71_v5 = vmul.f32 0.03125, %v66_v4 }
  0x9a   :  { %v73_v6 = vsub.f32 %v59_v0, %v71_v5  ;;  %v5384_v0 = vrot.slane %v132_v60, %v233_v57 }
  0x9b   :  { %v69_v7 = vpop.xlane.xlu0 %68 }
  0x9c   :  { %v72_v8 = vmul.f32 0.03125, %v69_v7  ;;  %v75_v9 = vmul.f32 %v73_v6, %v73_v6 }
  0x9e   :  { %v74_v10 = vsub.f32 %v60_v1, %v72_v8  ;;  %v77_v11 = vsel %vm63_vm0, %v75_v9, 0.0 }
  0x9f   :  { %78 = vadd.xlane.f32.xlu1 %v77_v11 }
  0xa0   :  { %v76_v12 = vmul.f32 %v74_v10, %v74_v10 }
  0xa2   :  { %v80_v13 = vsel %vm63_vm0, %v76_v12, 0.0 }
  0xa3   :  { %81 = vadd.xlane.f32.xlu1 %v80_v13 }
 0x12c   :  { %v79_v20 = vpop.xlane.xlu1 %78 }
 0x12d   :  { %v83_v21 = vmul.f32 0.03125, %v79_v20 }
 0x12f   :  { %v85_v22 = vadd.f32 1e-12, %v83_v21 }
 0x130   :  { %v82_v23 = vpop.xlane.xlu1 %81 }
 0x131   :  { %5096 = vrsqrt.f32 %v85_v22  ;;  %v84_v24 = vmul.f32 0.03125, %v82_v23 }
 0x133   :  { %v86_v25 = vadd.f32 1e-12, %v84_v24 }
 0x135   :  { %5098 = vrsqrt.f32 %v86_v25 }
 0x13b   :  { %v5097_v26 = vpop.eup %5096 }
 0x13c   :  { %v89_v28 = vmul.f32 %v5097_v26, %v73_v6 }
 0x13e   :  { %v97_v30 = vmul.f32 %v4444_v27, %v89_v28 }
 0x13f   :  { %v5099_v31 = vpop.eup %5098 }
 0x140   :  { %v90_v32 = vmul.f32 %v5099_v31, %v74_v10  ;;  %v5335_v33 = vadd.f32 %v4445_v29, %v97_v30 }
 0x142   :  { %v98_v34 = vmul.f32 %v4444_v27, %v90_v32  ;;  %4713 = vmatprep.mubr.msk.f32.mxu0 %vm63_vm0, %v5335_v33 }
 0x144   :  { %v5339_v35 = vadd.f32 %v4445_v29, %v98_v34 }
 0x146   :  { %4714 = vmatmul.mubr.msk.f32.vlgmr.msra.gmra.mrb[0].mxu0 %vm63_vm0, %v5339_v35 }
 0x147   :  { %4738 = vmatprep.mubr.msk.f32.mxu0 %vm5197_vm1, %v5196_v36 }
 0x219   :  { %v4715_v38 = vpop.f32.mrb[0].mxu0 }
 0x21a   :  { %v5352_v39 = vadd.f32 %v4715_v38, %v4446_v37  ;;  %v216_v40 = vpop.f32.mrb[1].mxu0 }
 0x21b   :  { %v5354_v41 = vadd.f32 %v4446_v37, %v216_v40 }
 0x21c   :  { %321 = vrot.lane.b32.xlu1 %v5352_v39, %s5198_s19  ;;  %v5371_v45 = vmul.f32 0.35355338, %v5352_v39 }
 0x21d   :  { %242 = vrot.lane.b32.xlu0 %v5354_v41, %s5198_s19  ;;  %v5362_v43 = vmul.f32 0.35355338, %v5354_v41 }
 0x28e   :  { %v322_v44 = vpop.permute.xlu1 %321 }
 0x28f   :  { %v243_v42 = vpop.permute.xlu0 %242 }
 0x290   :  { %4717 = vmatpush3.xpose.msk.msra.mxu1 %vm244_vm2, %v243_v42 }
 0x291   :  { %4721 = vmatprep.subr.mxu1 %v5196_v36 }
 0x293   :  { %4719 = vmatmul.mubr.msk.f32.vlgmr.msra.gmra.mrb[0].mxu1 %vm244_vm2, %v5362_v43 }
 0x294   :  { %4722 = vmatpush3.xpose.msk.msra.mxu1 %vm244_vm2, %v322_v44  ;;  %4723 = vmatprep.mubr.msk.f32.mxu1 %vm5197_vm1, %v5196_v36 }
 0x295   :  { %4726 = vmatprep.subr.mxu1 %v5196_v36 }
 0x297   :  { %4724 = vmatmul.mubr.msk.f32.vlgmr.msra.gmra.mrb[2].mxu1 %vm244_vm2, %v5371_v45 }
 0x298   :  { %4728 = vmatprep.mubr.msk.f32.mxu1 %vm5197_vm1, %v5196_v36 }
 0x366   :  { %v316_v61 = vpop.f32.mrb[0].mxu1 }
 0x367   :  { %v317_v62 = vadd.f32 %v316_v61, %v5381_v59  ;;  %v4720_v63 = vpop.f32.mrb[1].mxu1 }
 0x369   :  { %v398_v1 = vsel %vm244_vm2, %v317_v62, -inf }
 0x36a   :  { %399 = vmax.xlane.f32.xlu1 %v398_v1  ;;  %v394_v2 = vpop.f32.mrb[2].mxu1 }
 0x36b   :  { %v395_v3 = vadd.f32 %v394_v2, %v5384_v0  ;;  %v4725_v4 = vpop.f32.mrb[3].mxu1 }
 0x36d   :  { %v401_v5 = vsel %vm244_vm2, %v395_v3, -inf }
 0x36e   :  { %402 = vmax.xlane.f32.xlu0 %v401_v5 }
 0x37b   :  { %496 = vrot.lane.b32.xlu1 %v5352_v39, %s5200_s1 }
 0x37f   :  { %652 = vrot.lane.b32.xlu1 %v5352_v39, %s5201_s22 }
 0x3f7   :  { %v400_v6 = vpop.xlane.xlu1 %399 }
 0x3f8   :  { %v404_v7 = vsub.f32 %v317_v62, %v400_v6 }
 0x3fa   :  { %v406_v8 = vmul.f32 1.442695, %v404_v7 }
 0x3fb   :  { %v403_v9 = vpop.xlane.xlu0 %402  ;;  %v497_v16 = vpop.permute.xlu1 %496 }
 0x3fc   :  { %5100 = vpow2.f32 %v406_v8  ;;  %v405_v10 = vsub.f32 %v395_v3, %v403_v9 }
 0x3fe   :  { %v408_v11 = vmul.f32 1.442695, %v405_v10 }
 0x3ff   :  { %v653_v17 = vpop.permute.xlu1 %652 }
 0x400   :  { %5102 = vpow2.f32 %v408_v11 }
 0x406   :  { %v5101_v12 = vpop.eup %5100 }
 0x407   :  { %v410_v13 = vsel %vm244_vm2, %v5101_v12, 0.0 }
 0x408   :  { %411 = vadd.xlane.f32.xlu0 %v410_v13 }
 0x40a   :  { %v5103_v14 = vpop.eup %5102 }
 0x40b   :  { %v413_v15 = vsel %vm244_vm2, %v5103_v14, 0.0 }
 0x40c   :  { %414 = vadd.xlane.f32.xlu1 %v413_v15 }
 0x41d   :  { %650 = vrot.lane.b32.xlu1 %v5371_v45, %s5202_s2 }
 0x41e   :  { %420 = vrot.lane.b32.xlu0 %v5354_v41, %s5200_s1 }
 0x421   :  { %572 = vrot.lane.b32.xlu1 %v5362_v43, %s5202_s2 }
 0x422   :  { %574 = vrot.lane.b32.xlu0 %v5354_v41, %s5201_s22 }
 0x425   :  { %1066 = vrot.lane.b32.xlu1 %v5354_v41, %s5203_s23 }
 0x495   :  { %v412_v18 = vpop.xlane.xlu0 %411 }
 0x496   :  { %5104 = vrcp.f32 %v412_v18  ;;  %v227_v18 = vld [vmem:[%s5923_s6] sm:$0xff] }
 0x499   :  { %v415_v19 = vpop.xlane.xlu1 %414  ;;  %v421_v20 = vpop.permute.xlu0 %420 }
 0x49a   :  { %5106 = vrcp.f32 %v415_v19  ;;  %4727 = vmatpush3.msra.mxu1 %v421_v20 }
 0x49b   :  { %4731 = vmatprep.subr.mxu1 %v5196_v36 }
 0x49d   :  { %v651_v21 = vpop.permute.xlu1 %650  ;;  %v575_v22 = vpop.permute.xlu0 %574 }
 0x49e   :  { %4737 = vmatpush3.xpose.msk.msra.mxu0 %vm244_vm2, %v575_v22 }
 0x49f   :  { %4746 = vmatprep.subr.mxu0 %v5196_v36 }
 0x4a0   :  { %v5105_v23 = vpop.eup %5104 }
 0x4a1   :  { %v418_v24 = vmul.f32 %v5105_v23, %v5101_v12  ;;  %v573_v25 = vpop.permute.xlu1 %572 }
 0x4a2   :  { %4739 = vmatmul.mubr.msk.f32.vlgmr.msra.gmra.mrb[2].mxu0 %vm244_vm2, %v573_v25 }
 0x4a3   :  { %4729 = vmatmul.mubr.msk.f32.vlgmr.msra.gmra.mrb[4].mxu1 %vm244_vm2, %v418_v24  ;;  %4748 = vmatprep.mubr.msk.f32.mxu0 %vm5197_vm1, %v5196_v36 }
 0x4a4   :  { %v5107_v26 = vpop.eup %5106  ;;  %4732 = vmatpush3.msra.mxu1 %v497_v16  ;;  %4733 = vmatprep.mubr.msk.f32.mxu1 %vm5197_vm1, %v5196_v36 }
 0x4a5   :  { %v419_v27 = vmul.f32 %v5107_v26, %v5103_v14  ;;  %4741 = vmatprep.subr.mxu1 %v5196_v36  ;;  %v1067_v53 = vpop.permute.xlu1 %1066 }
 0x4a7   :  { %4734 = vmatmul.mubr.msk.f32.vlgmr.msra.gmra.mrb[6].mxu1 %vm244_vm2, %v419_v27 }
 0x4a8   :  { %4743 = vmatprep.mubr.msk.f32.mxu1 %vm5197_vm1, %v5196_v36 }
 0x4ab   :  { %4742 = vmatpush3.xpose.msk.msra.mxu1 %vm244_vm2, %v653_v17  ;;  %v228_v17 = vld [vmem:[%s5923_s6 + $0x8] sm:$0xff] }
 0x4ac   :  { %4751 = vmatprep.subr.mxu1 %v5196_v36 }
 0x4ae   :  { %4744 = vmatmul.mubr.msk.f32.vlgmr.msra.gmra.mrb[8].mxu1 %vm244_vm2, %v651_v21 }
 0x4af   :  { %4753 = vmatprep.mubr.msk.f32.mxu1 %vm5197_vm1, %v5196_v36 }
 0x575   :  { %v646_v28 = vpop.f32.mrb[2].mxu0 }
 0x576   :  { %v5423_v29 = vpop.f32.mrb[4].mxu1  ;;  %v4740_v30 = vpop.f32.mrb[3].mxu0  ;;  %v647_v51 = vadd.f32 %v646_v28, %v5381_v59 }
 0x577   :  { %v4730_v31 = vpop.f32.mrb[5].mxu1 }
 0x578   :  { %v728_v52 = vsel %vm244_vm2, %v647_v51, -inf }
 0x57a   :  { %v5425_v32 = vpop.f32.mrb[6].mxu1 }
 0x57b   :  { %v4735_v34 = vpop.f32.mrb[7].mxu1 }
 0x581   :  { %v724_v37 = vpop.f32.mrb[8].mxu1 }
 0x582   :  { %v725_v38 = vadd.f32 %v724_v37, %v5384_v0  ;;  %v4745_v40 = vpop.f32.mrb[9].mxu1  ;;  %v229_v37 = vld [vmem:[%s5923_s6 + $0x10] sm:$0xff] }
 0x584   :  { %v731_v42 = vsel %vm244_vm2, %v725_v38, -inf }
 0x585   :  { %732 = vmax.xlane.f32.xlu0 %v731_v42 }
 0x59b   :  { %826 = vrot.lane.b32.xlu0 %v5352_v39, %s5204_s24 }
 0x59f   :  { %1064 = vrot.lane.b32.xlu0 %v5362_v43, %s5205_s25 }
 0x5a3   :  { %1142 = vrot.lane.b32.xlu0 %v5371_v45, %s5205_s25 }
 0x612   :  { %v733_v44 = vpop.xlane.xlu0 %732 }
 0x613   :  { %v735_v46 = vsub.f32 %v725_v38, %v733_v44 }
 0x615   :  { %v738_v47 = vmul.f32 1.442695, %v735_v46 }
 0x616   :  { %v827_v48 = vpop.permute.xlu0 %826 }
 0x617   :  { %5108 = vpow2.f32 %v738_v47  ;;  %4752 = vmatpush3.msra.mxu1 %v827_v48 }
 0x618   :  { %4766 = vmatprep.subr.mxu1 %v5196_v36 }
 0x61a   :  { %v1065_v57 = vpop.permute.xlu0 %1064 }
 0x61e   :  { %v1143_v60 = vpop.permute.xlu0 %1142 }
 0x621   :  { %v5109_v49 = vpop.eup %5108 }
 0x622   :  { %v743_v50 = vsel %vm244_vm2, %v5109_v49, 0.0 }
 0x623   :  { %744 = vadd.xlane.f32.xlu1 %v743_v50 }
 0x634   :  { %1144 = vrot.lane.b32.xlu1 %v5352_v39, %s5203_s23 }
 0x658   :  { %729 = vmax.xlane.f32.xlu1 %v728_v52 }
 0x6b0   :  { %v745_v54 = vpop.xlane.xlu1 %744 }
 0x6b1   :  { %5110 = vrcp.f32 %v745_v54 }
 0x6b4   :  { %v1145_v58 = vpop.permute.xlu1 %1144 }
 0x6bb   :  { %v5111_v55 = vpop.eup %5110 }
 0x6bc   :  { %v749_v56 = vmul.f32 %v5111_v55, %v5109_v49 }
 0x6be   :  { %4754 = vmatmul.mubr.msk.f32.vlgmr.msra.gmra.mrb[10].mxu1 %vm244_vm2, %v749_v56 }
 0x6bf   :  { %4767 = vmatpush3.xpose.msk.msra.mxu1 %vm244_vm2, %v1067_v53  ;;  %4768 = vmatprep.mubr.msk.f32.mxu1 %vm5197_vm1, %v5196_v36 }
 0x6c0   :  { %4771 = vmatprep.subr.mxu1 %v5196_v36 }
 0x6c2   :  { %4769 = vmatmul.mubr.msk.f32.vlgmr.msra.gmra.mrb[12].mxu1 %vm244_vm2, %v1065_v57 }
 0x6c3   :  { %4772 = vmatpush3.xpose.msk.msra.mxu1 %vm244_vm2, %v1145_v58  ;;  %4773 = vmatprep.mubr.msk.f32.mxu1 %vm5197_vm1, %v5196_v36 }
 0x6c4   :  { %4781 = vmatprep.subr.mxu1 %v5196_v36 }
 0x6c6   :  { %4774 = vmatmul.mubr.msk.f32.vlgmr.msra.gmra.mrb[14].mxu1 %vm244_vm2, %v1143_v60 }
 0x6c7   :  { %4783 = vmatprep.mubr.msk.f32.mxu1 %vm5197_vm1, %v5196_v36 }
 0x6e5   :  { %v730_v61 = vpop.xlane.xlu1 %729 }
 0x6e6   :  { %v734_v62 = vsub.f32 %v647_v51, %v730_v61 }
 0x6e8   :  { %v736_v63 = vmul.f32 1.442695, %v734_v62 }
 0x6ea   :  { %5112 = vpow2.f32 %v736_v63 }
 0x6f4   :  { %v5113_v1 = vpop.eup %5112 }
 0x6f5   :  { %v740_v2 = vsel %vm244_vm2, %v5113_v1, 0.0 }
 0x6f6   :  { %741 = vadd.xlane.f32.xlu0 %v740_v2 }
 0x70c   :  { %750 = vrot.lane.b32.xlu0 %v5354_v41, %s5204_s24 }
 0x710   :  { %1318 = vrot.lane.b32.xlu0 %v5352_v39, %s5206_s26 }
 0x714   :  { %1479 = vrot.lane.b32.xlu0 %v5354_v41, %s5942_s27 }
 0x718   :  { %1557 = vrot.lane.b32.xlu0 %v5352_v39, %s5942_s27 }
 0x71c   :  { %1477 = vrot.lane.b32.xlu0 %v5362_v43, %s5940_s28 }
 0x783   :  { %v742_v3 = vpop.xlane.xlu0 %741 }
 0x784   :  { %5114 = vrcp.f32 %v742_v3 }
 0x787   :  { %v751_v4 = vpop.permute.xlu0 %750 }
 0x788   :  { %4747 = vmatpush3.msra.mxu0 %v751_v4 }
 0x789   :  { %4756 = vmatprep.subr.mxu0 %v228_v17 }
 0x78b   :  { %v1319_v5 = vpop.permute.xlu0 %1318 }
 0x78c   :  { %4782 = vmatpush3.msra.mxu1 %v1319_v5 }
 0x78d   :  { %4791 = vmatprep.subr.mxu1 %v5196_v36 }
 0x78e   :  { %v5115_v6 = vpop.eup %5114 }
 0x78f   :  { %v748_v7 = vmul.f32 %v5115_v6, %v5113_v1  ;;  %v1480_v40 = vpop.permute.xlu0 %1479 }
 0x791   :  { %4749 = vmatmul.mubr.msk.f32.vlgmr.msra.gmra.mrb[4].mxu0 %vm244_vm2, %v748_v7  ;;  %v898_v8 = vpop.f32.mrb[10].mxu1 }
 0x792   :  { %v4755_v9 = vpop.f32.mrb[11].mxu1  ;;  %4757 = vmatpush3.msra.mxu0 %v228_v17 }
 0x793   :  { %4761 = vmatprep.subr.mxu0 %v227_v18  ;;  %v1558_v44 = vpop.permute.xlu0 %1557 }
 0x795   :  { %v1138_v10 = vpop.f32.mrb[12].mxu1 }
 0x796   :  { %v1139_v11 = vadd.f32 %v1138_v10, %v5381_v59  ;;  %v4770_v12 = vpop.f32.mrb[13].mxu1 }
 0x797   :  { %v1478_v47 = vpop.permute.xlu0 %1477 }
 0x798   :  { %v1220_v43 = vsel %vm244_vm2, %v1139_v11, -inf }
 0x799   :  { %1221 = vmax.xlane.f32.xlu1 %v1220_v43  ;;  %v1216_v13 = vpop.f32.mrb[14].mxu1 }
 0x79a   :  { %v1217_v14 = vadd.f32 %v1216_v13, %v5384_v0  ;;  %v4775_v15 = vpop.f32.mrb[15].mxu1 }
 0x79b   :  { %v230_v15 = vld [vmem:[%s5923_s6 + $0x18] sm:$0xff] }
 0x79c   :  { %v1223_v16 = vsel %vm244_vm2, %v1217_v14, -inf }
 0x79d   :  { %1224 = vmax.xlane.f32.xlu1 %v1223_v16 }
 0x826   :  { %v1222_v19 = vpop.xlane.xlu1 %1221 }
 0x827   :  { %v1226_v20 = vsub.f32 %v1139_v11, %v1222_v19  ;;  %v4481_v19 = vld [vmem:[%s5924_s7] ss:$0 sm:$0xff] }
 0x829   :  { %v1228_v21 = vmul.f32 1.442695, %v1226_v20 }
 0x82a   :  { %v1225_v22 = vpop.xlane.xlu1 %1224 }
 0x82b   :  { %5116 = vpow2.f32 %v1228_v21  ;;  %v1227_v23 = vsub.f32 %v1217_v14, %v1225_v22 }
 0x82d   :  { %v1230_v24 = vmul.f32 1.442695, %v1227_v23 }
 0x82f   :  { %5118 = vpow2.f32 %v1230_v24 }
 0x835   :  { %v5117_v25 = vpop.eup %5116 }
 0x836   :  { %v1232_v26 = vsel %vm244_vm2, %v5117_v25, 0.0 }
 0x837   :  { %1233 = vadd.xlane.f32.xlu1 %v1232_v26 }
 0x839   :  { %v5119_v27 = vpop.eup %5118 }
 0x83a   :  { %v1235_v28 = vsel %vm244_vm2, %v5119_v27, 0.0 }
 0x83b   :  { %1236 = vadd.xlane.f32.xlu1 %v1235_v28 }
 0x84c   :  { %1242 = vrot.lane.b32.xlu1 %v5354_v41, %s5206_s26 }
 0x850   :  { %1555 = vrot.lane.b32.xlu1 %v5371_v45, %s5940_s28 }
 0x864   :  { %v822_v30 = vpop.f32.mrb[4].mxu0 }
 0x865   :  { %v4750_v31 = vpop.f32.mrb[5].mxu0  ;;  %4758 = vmatprep.mubr.msk.f32.mxu0 %vm244_vm2, %v822_v30 }
 0x866   :  { %4759 = vmatmul.mubr.msk.f32.vlgmr.msra.gmra.mrb[6].mxu0 %vm244_vm2, %v898_v8 }
 0x867   :  { %4763 = vmatprep.mubr.msk.f32.mxu0 %vm244_vm2, %v5423_v29  ;;  %4762 = vmatpush3.msra.mxu0 %v227_v18 }
 0x868   :  { %4776 = vmatprep.subr.mxu0 %v5196_v36 }
 0x86e   :  { %4764 = vmatmul.mubr.msk.f32.vlgmr.msra.gmra.mrb[6].mxu0 %vm244_vm2, %v5425_v32 }
 0x86f   :  { %4778 = vmatprep.mubr.msk.f32.mxu0 %vm5197_vm1, %v5196_v36 }
 0x8c4   :  { %v1234_v34 = vpop.xlane.xlu1 %1233 }
 0x8c5   :  { %5120 = vrcp.f32 %v1234_v34 }
 0x8c8   :  { %v1237_v45 = vpop.xlane.xlu1 %1236 }
 0x8c9   :  { %5122 = vrcp.f32 %v1237_v45 }
 0x8cc   :  { %v1243_v38 = vpop.permute.xlu1 %1242 }
 0x8cd   :  { %4777 = vmatpush3.msra.mxu0 %v1243_v38 }
 0x8ce   :  { %4786 = vmatprep.subr.mxu0 %v229_v37 }
 0x8cf   :  { %v5121_v29 = vpop.eup %5120 }
 0x8d0   :  { %v1240_v42 = vmul.f32 %v5121_v29, %v5117_v25  ;;  %v1556_v52 = vpop.permute.xlu1 %1555 }
 0x8d2   :  { %4779 = vmatmul.mubr.msk.f32.vlgmr.msra.gmra.mrb[8].mxu0 %vm244_vm2, %v1240_v42  ;;  %v1946_v42 = vld [vmem:[%s5925_s10 + $0x8] sm:$0xff] }
 0x8d3   :  { %v5123_v32 = vpop.eup %5122  ;;  %4787 = vmatpush3.msra.mxu0 %v229_v37 }
 0x8d4   :  { %v1241_v46 = vmul.f32 %v5123_v32, %v5119_v27  ;;  %4796 = vmatprep.subr.mxu0 %v5196_v36 }
 0x8d6   :  { %4784 = vmatmul.mubr.msk.f32.vlgmr.msra.gmra.mrb[16].mxu1 %vm244_vm2, %v1241_v46  ;;  %v1948_v46 = vld [vmem:[%s5925_s10 + $0x18] sm:$0xff] }
 0x8d7   :  { %4792 = vmatpush3.xpose.msk.msra.mxu1 %vm244_vm2, %v1480_v40  ;;  %4793 = vmatprep.mubr.msk.f32.mxu1 %vm5197_vm1, %v5196_v36 }
 0x8d8   :  { %4801 = vmatprep.subr.mxu1 %v5196_v36 }
 0x8da   :  { %4794 = vmatmul.mubr.msk.f32.vlgmr.msra.gmra.mrb[18].mxu1 %vm244_vm2, %v1478_v47 }
 0x8db   :  { %4803 = vmatprep.mubr.msk.f32.mxu1 %vm5197_vm1, %v5196_v36 }
 0x9a5   :  { %v1314_v48 = vpop.f32.mrb[8].mxu0 }
 0x9a6   :  { %v4780_v49 = vpop.f32.mrb[9].mxu0  ;;  %4788 = vmatprep.mubr.msk.f32.mxu0 %vm244_vm2, %v1314_v48 }
 0x9a9   :  { %v1390_v50 = vpop.f32.mrb[16].mxu1 }
 0x9aa   :  { %v4785_v51 = vpop.f32.mrb[17].mxu1  ;;  %4789 = vmatmul.mubr.msk.f32.vlgmr.msra.gmra.mrb[6].mxu0 %vm244_vm2, %v1390_v50 }
 0x9ab   :  { %4797 = vmatpush3.xpose.msk.msra.mxu0 %vm244_vm2, %v1558_v44  ;;  %4798 = vmatprep.mubr.msk.f32.mxu0 %vm5197_vm1, %v5196_v36  ;;  %v1947_v44 = vld [vmem:[%s5925_s10 + $0x10] sm:$0xff] }
 0x9ac   :  { %4806 = vmatprep.subr.mxu0 %v5196_v36  ;;  %v5010_v47 = vpack.c.bf16 %v1948_v46, %v1947_v44 }
 0x9ad   :  { %v1551_v53 = vpop.f32.mrb[18].mxu1 }
 0x9ae   :  { %v1552_v54 = vadd.f32 %v1551_v53, %v5381_v59  ;;  %v4795_v55 = vpop.f32.mrb[19].mxu1  ;;  %4799 = vmatmul.mubr.msk.f32.vlgmr.msra.gmra.mrb[10].mxu0 %vm244_vm2, %v1556_v52 }
 0x9af   :  { %4808 = vmatprep.mubr.msk.f32.mxu0 %vm5197_vm1, %v5196_v36  ;;  %v4482_v55 = vld [vmem:[%s5926_s8] ss:$0 sm:$0xff] }
 0x9b0   :  { %v1633_v56 = vsel %vm244_vm2, %v1552_v54, -inf }
 0x9b1   :  { %1634 = vmax.xlane.f32.xlu0 %v1633_v56 }
 0xa3e   :  { %v1635_v57 = vpop.xlane.xlu0 %1634 }
 0xa3f   :  { %v1639_v58 = vsub.f32 %v1552_v54, %v1635_v57 }
 0xa41   :  { %v1641_v60 = vmul.f32 1.442695, %v1639_v58 }
 0xa43   :  { %5124 = vpow2.f32 %v1641_v60  ;;  %v4483_v60 = vld [vmem:[%s5927_s9] ss:$0 sm:$0xff] }
 0xa4d   :  { %v5125_v61 = vpop.eup %5124 }
 0xa4e   :  { %v1645_v62 = vsel %vm244_vm2, %v5125_v61, 0.0 }
 0xa4f   :  { %1646 = vadd.xlane.f32.xlu0 %v1645_v62 }
 0xa81   :  { %v1629_v63 = vpop.f32.mrb[10].mxu0 }
 0xa82   :  { %v1630_v1 = vadd.f32 %v1629_v63, %v5384_v0  ;;  %v4800_v2 = vpop.f32.mrb[11].mxu0 }
 0xa83   :  { %v2091_v2 = vld [vmem:[%s5928_s12] sm:$0xff] }
 0xa84   :  { %v1636_v3 = vsel %vm244_vm2, %v1630_v1, -inf }
 0xa85   :  { %1637 = vmax.xlane.f32.xlu1 %v1636_v3  ;;  %v2092_v3 = vld [vmem:[%s5928_s12 + $0x8] sm:$0xff] }
 0xa96   :  { %1731 = vrot.lane.b32.xlu1 %v5352_v39, %s5938_s29 }
 0xadc   :  { %v1647_v10 = vpop.xlane.xlu0 %1646 }
 0xb12   :  { %v1638_v4 = vpop.xlane.xlu1 %1637 }
 0xb13   :  { %v1640_v5 = vsub.f32 %v1630_v1, %v1638_v4  ;;  %v5014_v4 = vpack.c.bf16 %v2092_v3, %v2091_v2 }
 0xb15   :  { %v1643_v6 = vmul.f32 1.442695, %v1640_v5  ;;  %v2093_v5 = vld [vmem:[%s5928_s12 + $0x10] sm:$0xff] }
 0xb16   :  { %v1732_v7 = vpop.permute.xlu1 %1731 }
 0xb17   :  { %5126 = vpow2.f32 %v1643_v6  ;;  %4807 = vmatpush3.msra.mxu0 %v1732_v7  ;;  %v2094_v6 = vld [vmem:[%s5928_s12 + $0x18] sm:$0xff] }
 0xb18   :  { %5128 = vrcp.f32 %v1647_v10  ;;  %4811 = vmatprep.subr.mxu0 %v230_v15  ;;  %v5018_v7 = vpack.c.bf16 %v2094_v6, %v2093_v5 }
 0xb21   :  { %v5127_v8 = vpop.eup %5126 }
 0xb22   :  { %v1648_v9 = vsel %vm244_vm2, %v5127_v8, 0.0  ;;  %v5129_v12 = vpop.eup %5128 }
 0xb23   :  { %1649 = vadd.xlane.f32.xlu0 %v1648_v9  ;;  %v1653_v43 = vmul.f32 %v5129_v12, %v5125_v61  ;;  %v2096_v9 = vld [vmem:[%s5928_s12 + $0x28] sm:$0xff]  ;;  %v2098_v12 = vld [vmem:[%s5928_s12 + $0x38] sm:$0xff] }
 0xb39   :  { %1655 = vrot.lane.b32.xlu0 %v5354_v41, %s5938_s29 }
 0xbb0   :  { %v1650_v11 = vpop.xlane.xlu0 %1649 }
 0xbb1   :  { %5130 = vrcp.f32 %v1650_v11  ;;  %v2097_v11 = vld [vmem:[%s5928_s12 + $0x30] sm:$0xff] }
 0xbb4   :  { %v1656_v39 = vpop.permute.xlu0 %1655 }
 0xbb5   :  { %4802 = vmatpush3.msra.mxu1 %v1656_v39  ;;  %v4484_v39 = vld [vmem:[%s5929_s11] ss:$0 sm:$0xff] }
 0xbb6   :  { %4804 = vmatmul.mubr.msk.f32.vlgmr.msra.gmra.mrb[20].mxu1 %vm244_vm2, %v1653_v43  ;;  %v5026_v43 = vpack.c.bf16 %v2098_v12, %v2097_v11  ;;  %v4487_v11 = vld [vmem:[%s5930_s13] ss:$0 sm:$0xff] }
 0xbbb   :  { %v5131_v13 = vpop.eup %5130 }
 0xbbc   :  { %v1654_v14 = vmul.f32 %v5131_v13, %v5127_v8  ;;  %v2095_v8 = vld [vmem:[%s5928_s12 + $0x20] sm:$0xff] }
 0xbbd   :  { %v5022_v10 = vpack.c.bf16 %v2096_v9, %v2095_v8 }
 0xbbe   :  { %4809 = vmatmul.mubr.msk.f32.vlgmr.msra.gmra.mrb[12].mxu0 %vm244_vm2, %v1654_v14 }
 0xbbf   :  { %4812 = vmatpush3.msra.mxu0 %v230_v15 }
 0xbc0   :  { %5015 = vmatprep.subr.bf16.mxu0 %v5014_v4 }
 0xc89   :  { %v1727_v41 = vpop.f32.mrb[20].mxu1 }
 0xc8a   :  { %v4805_v16 = vpop.f32.mrb[21].mxu1  ;;  %4813 = vmatprep.mubr.msk.f32.mxu0 %vm244_vm2, %v1727_v41 }
 0xc91   :  { %v1803_v17 = vpop.f32.mrb[12].mxu0 }
 0xc92   :  { %v4810_v18 = vpop.f32.mrb[13].mxu0  ;;  %4814 = vmatmul.mubr.msk.f32.vlgmr.msra.gmra.mrb[6].mxu0 %vm244_vm2, %v1803_v17 }
 0xc93   :  { %5017 = vmatpush3.bf16.msra.mxu0 %v5014_v4 }
 0xc94   :  { %5019 = vmatprep.subr.bf16.mxu0 %v5018_v7 }
 0xc97   :  { %5021 = vmatpush3.bf16.msra.mxu0 %v5018_v7 }
 0xc98   :  { %5023 = vmatprep.subr.bf16.mxu0 %v5022_v10 }
 0xc9b   :  { %5025 = vmatpush3.bf16.msra.mxu0 %v5022_v10 }
 0xc9c   :  { %5027 = vmatprep.subr.bf16.mxu0 %v5026_v43 }
 0xc9f   :  { %5029 = vmatpush3.bf16.msra.mxu0 %v5026_v43 }
 0xca0   :  { %4867 = vmatprep.subr.mxu0 %v5196_v36 }
 0xd65   :  { %v4815_v20 = vpop.f32.mrb[6].mxu0 }
 0xd66   :  { %v1898_v21 = vadd.f32 %v4815_v20, %v4481_v19  ;;  %v1879_v22 = vpop.f32.mrb[7].mxu0 }
 0xd67   :  { %v1897_v23 = vadd.f32 %v4481_v19, %v1879_v22 }
 0xd68   :  { %v1900_v24 = vadd.f32 %v1898_v21, %v5339_v35 }
 0xd69   :  { %v1899_v25 = vadd.f32 %v1897_v23, %v5335_v33  ;;  %v1945_v33 = vld [vmem:[%s5925_s10] sm:$0xff] }
 0xd6a   :  { %v1906_v26 = vsel %vm63_vm0, %v1900_v24, 0.0  ;;  %v5006_v32 = vpack.c.bf16 %v1946_v42, %v1945_v33 }
 0xd6b   :  { %1907 = vadd.xlane.f32.xlu0 %v1906_v26  ;;  %v1903_v27 = vsel %vm63_vm0, %v1899_v25, 0.0 }
 0xd6c   :  { %1904 = vadd.xlane.f32.xlu1 %v1903_v27  ;;  %5007 = vmatprep.subr.bf16.mxu1 %v5006_v32 }
 0xd6d   :  { %5009 = vmatpush3.bf16.msra.mxu1 %v5006_v32 }
 0xd6e   :  { %5011 = vmatprep.subr.bf16.mxu1 %v5010_v47 }
 0xd71   :  { %5013 = vmatpush3.bf16.msra.mxu1 %v5010_v47 }
 0xdf8   :  { %v1908_v28 = vpop.xlane.xlu0 %1907 }
 0xdf9   :  { %v1910_v30 = vmul.f32 0.03125, %v1908_v28  ;;  %v1905_v31 = vpop.xlane.xlu1 %1904 }
 0xdfa   :  { %v1909_v34 = vmul.f32 0.03125, %v1905_v31 }
 0xdfb   :  { %v1912_v45 = vsub.f32 %v1900_v24, %v1910_v30 }
 0xdfc   :  { %v1911_v37 = vsub.f32 %v1899_v25, %v1909_v34 }
 0xdfd   :  { %v1914_v38 = vmul.f32 %v1912_v45, %v1912_v45 }
 0xdfe   :  { %v1913_v40 = vmul.f32 %v1911_v37, %v1911_v37 }
 0xdff   :  { %v1918_v29 = vsel %vm63_vm0, %v1914_v38, 0.0 }
 0xe00   :  { %1919 = vadd.xlane.f32.xlu1 %v1918_v29  ;;  %v1915_v35 = vsel %vm63_vm0, %v1913_v40, 0.0 }
 0xe01   :  { %1916 = vadd.xlane.f32.xlu0 %v1915_v35 }
 0xe8d   :  { %v1920_v48 = vpop.xlane.xlu1 %1919 }
 0xe8e   :  { %v1922_v49 = vmul.f32 0.03125, %v1920_v48  ;;  %v1917_v50 = vpop.xlane.xlu0 %1916 }
 0xe8f   :  { %v1921_v51 = vmul.f32 0.03125, %v1917_v50 }
 0xe90   :  { %v1924_v52 = vadd.f32 1e-12, %v1922_v49 }
 0xe91   :  { %v1923_v53 = vadd.f32 1e-12, %v1921_v51 }
 0xe92   :  { %5132 = vrsqrt.f32 %v1924_v52 }
 0xe93   :  { %5134 = vrsqrt.f32 %v1923_v53 }
 0xe9c   :  { %v5133_v54 = vpop.eup %5132 }
 0xe9d   :  { %v5135_v56 = vpop.eup %5134  ;;  %v1928_v57 = vmul.f32 %v5133_v54, %v1912_v45 }
 0xe9e   :  { %v1927_v58 = vmul.f32 %v5135_v56, %v1911_v37 }
 0xe9f   :  { %v1936_v61 = vmul.f32 %v4482_v55, %v1928_v57 }
 0xea0   :  { %v1935_v62 = vmul.f32 %v4482_v55, %v1927_v58 }
 0xea1   :  { %v5560_v1 = vadd.f32 %v4483_v60, %v1936_v61 }
 0xea2   :  { %v5558_v63 = vadd.f32 %v4483_v60, %v1935_v62  ;;  %v5210_v60 = vmov -1.0  }
 0xea4   :  { %4824 = vmatprep.mubr.msk.f32.mxu1 %vm63_vm0, %v5558_v63 }
 0xea5   :  { %4825 = vmatmul.mubr.msk.f32.vlgmr.msra.gmra.mrb[22].mxu1 %vm63_vm0, %v5560_v1 }
 0xf78   :  { %v4826_v13 = vpop.f32.mrb[22].mxu1 }
 0xf79   :  { %v2034_v14 = vadd.f32 %v4826_v13, %v4484_v39  ;;  %v2028_v15 = vpop.f32.mrb[23].mxu1 }
 0xf7a   :  { %v2029_v41 = vadd.f32 %v4484_v39, %v2028_v15 }
 0xf7b   :  { %v2040_v16 = vmul.f32 0.70710677, %v2034_v14  ;;  %v2038_v8 = vmul.f32 0.5, %v2034_v14 }
 0xf7c   :  { %v2039_v17 = vmul.f32 0.70710677, %v2029_v41  ;;  %v2037_v6 = vmul.f32 0.5, %v2029_v41 }
 0xf7d   :  { %v2046_v18 = vand.u32 2147483647, %v2040_v16  ;;  %vm2042_vm3 = vcmp.ge.f32.partialorder %v2040_v16, 0.0 }
 0xf7e   :  { %v2045_v19 = vand.u32 2147483647, %v2039_v17  ;;  %vm2041_vm4 = vcmp.ge.f32.partialorder %v2039_v17, 0.0  ;;  %v2044_v61 = vsel %vm2042_vm3, 1.0, %v5210_v60 }
 0xf7f   :  { %v2048_v20 = vmul.f32 0.3275911, %v2046_v18  ;;  %v2074_v24 = vsub.f32 0.0, %v2046_v18  ;;  %v2043_v3 = vsel %vm2041_vm4, 1.0, %v5210_v60 }
 0xf80   :  { %v2047_v21 = vmul.f32 0.3275911, %v2045_v19  ;;  %v2073_v25 = vsub.f32 0.0, %v2045_v19 }
 0xf81   :  { %v2050_v22 = vadd.f32 1.0, %v2048_v20  ;;  %v2076_v27 = vmul.f32 %v2074_v24, %v2046_v18 }
 0xf82   :  { %v2049_v23 = vadd.f32 1.0, %v2047_v21  ;;  %v2075_v31 = vmul.f32 %v2073_v25, %v2045_v19 }
 0xf83   :  { %5136 = vrcp.f32 %v2050_v22  ;;  %v2079_v37 = vmul.f32 1.442695, %v2076_v27 }
 0xf84   :  { %5138 = vrcp.f32 %v2049_v23  ;;  %v2077_v29 = vmul.f32 1.442695, %v2075_v31 }
 0xf85   :  { %5140 = vpow2.f32 %v2079_v37 }
 0xf86   :  { %5142 = vpow2.f32 %v2077_v29 }
 0xf8d   :  { %v5137_v26 = vpop.eup %5136 }
 0xf8e   :  { %v5139_v28 = vpop.eup %5138  ;;  %v2056_v30 = vmul.f32 1.0614054, %v5137_v26 }
 0xf8f   :  { %v2055_v34 = vmul.f32 1.0614054, %v5139_v28  ;;  %v5141_v53 = vpop.eup %5140 }
 0xf90   :  { %v2058_v45 = vadd.f32 -1.4531521, %v2056_v30  ;;  %v5143_v55 = vpop.eup %5142  ;;  %v4495_v30 = vld [vmem:[%s5948_s20 + $0x38] sm:$0xff] }
 0xf91   :  { %v2057_v38 = vadd.f32 -1.4531521, %v2055_v34 }
 0xf92   :  { %v2060_v40 = vmul.f32 %v5137_v26, %v2058_v45 }
 0xf93   :  { %v2059_v35 = vmul.f32 %v5139_v28, %v2057_v38 }
 0xf94   :  { %v2062_v33 = vadd.f32 1.4214138, %v2060_v40 }
 0xf95   :  { %v2061_v42 = vadd.f32 1.4214138, %v2059_v35 }
 0xf96   :  { %v2064_v32 = vmul.f32 %v5137_v26, %v2062_v33  ;;  %v4490_v33 = vld [vmem:[%s5931_s14] ss:$0 sm:$0xff] }
 0xf97   :  { %v2063_v44 = vmul.f32 %v5139_v28, %v2061_v42 }
 0xf98   :  { %v2066_v46 = vadd.f32 -0.28449672, %v2064_v32 }
 0xf99   :  { %v2065_v47 = vadd.f32 -0.28449672, %v2063_v44 }
 0xf9a   :  { %v2068_v48 = vmul.f32 %v5137_v26, %v2066_v46  ;;  %v4491_v46 = vld [vmem:[%s5932_s15] ss:$0 sm:$0xff] }
 0xf9b   :  { %v2067_v49 = vmul.f32 %v5139_v28, %v2065_v47 }
 0xf9c   :  { %v2070_v50 = vadd.f32 0.2548296, %v2068_v48 }
 0xf9d   :  { %v2069_v51 = vadd.f32 0.2548296, %v2067_v49 }
 0xf9e   :  { %v2072_v52 = vmul.f32 %v5137_v26, %v2070_v50  ;;  %v4493_v26 = vld [vmem:[%s5948_s20 + $0x28] sm:$0xff] }
 0xf9f   :  { %v2071_v54 = vmul.f32 %v5139_v28, %v2069_v51  ;;  %v4494_v28 = vld [vmem:[%s5948_s20 + $0x30] sm:$0xff]  ;;  %v4497_v51 = vld [vmem:[%s5921_s5 + $0x1] ss:$0 sm:$0xff]  ;;  %s5950_s5 = smov 72  }
 0xfa0   :  { %v2082_v56 = vmul.f32 %v5141_v53, %v2072_v52  ;;  %v5034_v31 = vpack.c.bf16 %v4495_v30, %v4494_v28 }
 0xfa1   :  { %v2081_v57 = vmul.f32 %v5143_v55, %v2071_v54 }
 0xfa2   :  { %v2084_v58 = vsub.f32 1.0, %v2082_v56 }
 0xfa3   :  { %v2083_v62 = vsub.f32 1.0, %v2081_v57 }
 0xfa4   :  { %v2086_v2 = vmul.f32 %v2084_v58, %v2044_v61 }
 0xfa5   :  { %v2085_v4 = vmul.f32 %v2083_v62, %v2043_v3 }
 0xfa6   :  { %v2088_v5 = vadd.f32 1.0, %v2086_v2 }
 0xfa7   :  { %v2087_v7 = vadd.f32 1.0, %v2085_v4 }
 0xfa8   :  { %v2090_v10 = vmul.f32 %v2088_v5, %v2038_v8 }
 0xfa9   :  { %v2089_v9 = vmul.f32 %v2087_v7, %v2037_v6 }
 0xfab   :  { %4843 = vmatprep.mubr.msk.f32.mxu0 %vm2106_vm5, %v2089_v9 }
 0xfac   :  { %4844 = vmatmul.mubr.msk.f32.vlgmr.msra.gmra.mrb[14].mxu0 %vm2106_vm5, %v2090_v10 }
 0xfad   :  { %4869 = vmatprep.mubr.msk.f32.mxu0 %vm5197_vm1, %v5196_v36 }
0x107f   :  { %v4845_v12 = vpop.f32.mrb[14].mxu0 }
0x1080   :  { %v2185_v43 = vadd.f32 %v4845_v12, %v4487_v11  ;;  %v2179_v39 = vpop.f32.mrb[15].mxu0 }
0x1081   :  { %v2180_v13 = vadd.f32 %v4487_v11, %v2179_v39 }
0x1082   :  { %v2189_v14 = vadd.f32 %v2185_v43, %v5560_v1 }
0x1083   :  { %v2188_v15 = vadd.f32 %v2180_v13, %v5558_v63  ;;  %v4492_v63 = vld [vmem:[%s5948_s20 + $0x20] sm:$0xff] }
0x1084   :  { %v2195_v41 = vsel %vm63_vm0, %v2189_v14, 0.0  ;;  %v5030_v27 = vpack.c.bf16 %v4493_v26, %v4492_v63 }
0x1085   :  { %2196 = vadd.xlane.f32.xlu1 %v2195_v41  ;;  %v2192_v16 = vsel %vm63_vm0, %v2188_v15, 0.0 }
0x1086   :  { %2193 = vadd.xlane.f32.xlu0 %v2192_v16  ;;  %5031 = vmatprep.subr.bf16.mxu1 %v5030_v27 }
0x1087   :  { %5033 = vmatpush3.bf16.msra.mxu1 %v5030_v27 }
0x1088   :  { %5035 = vmatprep.subr.bf16.mxu1 %v5034_v31 }
0x108b   :  { %5037 = vmatpush3.bf16.msra.mxu1 %v5034_v31 }
0x108c   :  { %4857 = vmatprep.subr.mxu1 %v5196_v36 }
0x1112   :  { %v2197_v17 = vpop.xlane.xlu1 %2196 }
0x1113   :  { %v2199_v18 = vmul.f32 0.03125, %v2197_v17  ;;  %v2194_v19 = vpop.xlane.xlu0 %2193 }
0x1114   :  { %v2198_v20 = vmul.f32 0.03125, %v2194_v19 }
0x1115   :  { %v2201_v21 = vsub.f32 %v2189_v14, %v2199_v18 }
0x1116   :  { %v2200_v22 = vsub.f32 %v2188_v15, %v2198_v20 }
0x1117   :  { %v2203_v23 = vmul.f32 %v2201_v21, %v2201_v21 }
0x1118   :  { %v2202_v24 = vmul.f32 %v2200_v22, %v2200_v22 }
0x1119   :  { %v2207_v25 = vsel %vm63_vm0, %v2203_v23, 0.0 }
0x111a   :  { %2208 = vadd.xlane.f32.xlu1 %v2207_v25  ;;  %v2204_v1 = vsel %vm63_vm0, %v2202_v24, 0.0 }
0x111b   :  { %2205 = vadd.xlane.f32.xlu0 %v2204_v1 }
0x11a7   :  { %v2209_v34 = vpop.xlane.xlu1 %2208 }
0x11a8   :  { %v2211_v45 = vmul.f32 0.03125, %v2209_v34  ;;  %v2206_v37 = vpop.xlane.xlu0 %2205 }
0x11a9   :  { %v2210_v38 = vmul.f32 0.03125, %v2206_v37 }
0x11aa   :  { %v2213_v40 = vadd.f32 1e-12, %v2211_v45 }
0x11ab   :  { %v2212_v29 = vadd.f32 1e-12, %v2210_v38 }
0x11ac   :  { %5144 = vrsqrt.f32 %v2213_v40 }
0x11ad   :  { %5146 = vrsqrt.f32 %v2212_v29 }
0x11b6   :  { %v5145_v35 = vpop.eup %5144 }
0x11b7   :  { %v5147_v42 = vpop.eup %5146  ;;  %v2217_v32 = vmul.f32 %v5145_v35, %v2201_v21 }
0x11b8   :  { %v2216_v44 = vmul.f32 %v5147_v42, %v2200_v22 }
0x11b9   :  { %v2225_v47 = vmul.f32 %v4490_v33, %v2217_v32 }
0x11ba   :  { %v2224_v48 = vmul.f32 %v4490_v33, %v2216_v44 }
0x11bb   :  { %v5630_v50 = vadd.f32 %v4491_v46, %v2225_v47 }
0x11bc   :  { %v5628_v49 = vadd.f32 %v4491_v46, %v2224_v48 }
0x11be   :  { %4854 = vmatprep.mubr.msk.f32.mxu1 %vm63_vm0, %v5628_v49 }
0x11bf   :  { %4855 = vmatmul.mubr.msk.f32.vlgmr.msra.gmra.mrb[24].mxu1 %vm63_vm0, %v5630_v50 }
0x11c0   :  { %4859 = vmatprep.mubr.msk.f32.mxu1 %vm5197_vm1, %v5196_v36 }
0x1292   :  { %v4856_v52 = vpop.f32.mrb[24].mxu1 }
0x1293   :  { %v5641_v53 = vadd.f32 %v4856_v52, %v4497_v51  ;;  %v2319_v54 = vpop.f32.mrb[25].mxu1 }
0x1294   :  { %v5643_v55 = vadd.f32 %v4497_v51, %v2319_v54 }
0x1295   :  { %2414 = vrot.lane.b32.xlu1 %v5641_v53, %s5198_s19  ;;  %v5660_v61 = vmul.f32 0.35355338, %v5641_v53 }
0x1296   :  { %2336 = vrot.lane.b32.xlu0 %v5643_v55, %s5198_s19  ;;  %v5651_v57 = vmul.f32 0.35355338, %v5643_v55  ;;  %s5951_s19 = smov 104  }
0x1307   :  { %v2415_v58 = vpop.permute.xlu1 %2414 }
0x1308   :  { %v2337_v56 = vpop.permute.xlu0 %2336 }
0x1309   :  { %4858 = vmatpush3.xpose.msk.msra.mxu1 %vm244_vm2, %v2337_v56 }
0x130a   :  { %4862 = vmatprep.subr.mxu1 %v5196_v36 }
0x130c   :  { %4860 = vmatmul.mubr.msk.f32.vlgmr.msra.gmra.mrb[26].mxu1 %vm244_vm2, %v5651_v57 }
0x130d   :  { %4863 = vmatpush3.xpose.msk.msra.mxu1 %vm244_vm2, %v2415_v58  ;;  %4864 = vmatprep.mubr.msk.f32.mxu1 %vm5197_vm1, %v5196_v36 }
0x130e   :  { %4872 = vmatprep.subr.mxu1 %v5196_v36 }
0x1310   :  { %4865 = vmatmul.mubr.msk.f32.vlgmr.msra.gmra.mrb[28].mxu1 %vm244_vm2, %v5660_v61 }
0x1311   :  { %4874 = vmatprep.mubr.msk.f32.mxu1 %vm5197_vm1, %v5196_v36 }
0x13df   :  { %v2409_v62 = vpop.f32.mrb[26].mxu1 }
0x13e0   :  { %v4861_v2 = vpop.f32.mrb[27].mxu1  ;;  %v2410_v7 = vadd.f32 %v2409_v62, %v5381_v59 }
0x13e2   :  { %v2491_v8 = vsel %vm244_vm2, %v2410_v7, -inf }
0x13e3   :  { %v2487_v3 = vpop.f32.mrb[28].mxu1 }
0x13e4   :  { %v2488_v4 = vadd.f32 %v2487_v3, %v5384_v0  ;;  %v4866_v5 = vpop.f32.mrb[29].mxu1 }
0x13e6   :  { %v2494_v6 = vsel %vm244_vm2, %v2488_v4, -inf }
0x13e7   :  { %2495 = vmax.xlane.f32.xlu1 %v2494_v6 }
0x13f8   :  { %2745 = vrot.lane.b32.xlu1 %v5641_v53, %s5201_s22 }
0x13fc   :  { %2743 = vrot.lane.b32.xlu1 %v5660_v61, %s5202_s2 }
0x1420   :  { %2492 = vmax.xlane.f32.xlu1 %v2491_v8 }
0x1431   :  { %2667 = vrot.lane.b32.xlu1 %v5643_v55, %s5201_s22 }
0x1435   :  { %2665 = vrot.lane.b32.xlu1 %v5651_v57, %s5202_s2 }
0x1439   :  { %3159 = vrot.lane.b32.xlu1 %v5643_v55, %s5203_s23 }
0x1474   :  { %v2496_v9 = vpop.xlane.xlu1 %2495 }
0x1475   :  { %v2498_v10 = vsub.f32 %v2488_v4, %v2496_v9 }
0x1477   :  { %v2501_v11 = vmul.f32 1.442695, %v2498_v10 }
0x1478   :  { %v2746_v39 = vpop.permute.xlu1 %2745 }
0x1479   :  { %5148 = vpow2.f32 %v2501_v11 }
0x147c   :  { %v2744_v13 = vpop.permute.xlu1 %2743 }
0x1483   :  { %v5149_v12 = vpop.eup %5148 }
0x1484   :  { %v2506_v43 = vsel %vm244_vm2, %v5149_v12, 0.0 }
0x1485   :  { %2507 = vadd.xlane.f32.xlu0 %v2506_v43 }
0x149b   :  { %2589 = vrot.lane.b32.xlu0 %v5641_v53, %s5200_s1 }
0x14ad   :  { %v2493_v14 = vpop.xlane.xlu1 %2492 }
0x14ae   :  { %v2497_v15 = vsub.f32 %v2410_v7, %v2493_v14 }
0x14b0   :  { %v2499_v41 = vmul.f32 1.442695, %v2497_v15 }
0x14b1   :  { %v2668_v25 = vpop.permute.xlu1 %2667 }
0x14b2   :  { %5150 = vpow2.f32 %v2499_v41 }
0x14b5   :  { %v2666_v63 = vpop.permute.xlu1 %2665 }
0x14b9   :  { %v3160_v48 = vpop.permute.xlu1 %3159 }
0x14bc   :  { %v5151_v16 = vpop.eup %5150 }
0x14bd   :  { %v2503_v17 = vsel %vm244_vm2, %v5151_v16, 0.0 }
0x14be   :  { %2504 = vadd.xlane.f32.xlu0 %v2503_v17 }
0x14d4   :  { %2513 = vrot.lane.b32.xlu0 %v5643_v55, %s5200_s1 }
0x1512   :  { %v2508_v18 = vpop.xlane.xlu0 %2507 }
0x1513   :  { %5152 = vrcp.f32 %v2508_v18  ;;  %v4501_v18 = vld [vmem:[%s5923_s6 + $0x28] sm:$0xff] }
0x1516   :  { %v2590_v19 = vpop.permute.xlu0 %2589 }
0x1517   :  { %4873 = vmatpush3.msra.mxu1 %v2590_v19  ;;  %v4500_v19 = vld [vmem:[%s5923_s6 + $0x20] sm:$0xff] }
0x1518   :  { %4882 = vmatprep.subr.mxu1 %v5196_v36 }
0x151d   :  { %v5153_v20 = vpop.eup %5152 }
0x151e   :  { %v2512_v21 = vmul.f32 %v5153_v20, %v5149_v12 }
0x1520   :  { %4875 = vmatmul.mubr.msk.f32.vlgmr.msra.gmra.mrb[30].mxu1 %vm244_vm2, %v2512_v21 }
0x1521   :  { %4883 = vmatpush3.xpose.msk.msra.mxu1 %vm244_vm2, %v2746_v39  ;;  %4884 = vmatprep.mubr.msk.f32.mxu1 %vm5197_vm1, %v5196_v36 }
0x1522   :  { %4892 = vmatprep.subr.mxu1 %v5196_v36 }
0x1524   :  { %4885 = vmatmul.mubr.msk.f32.vlgmr.msra.gmra.mrb[32].mxu1 %vm244_vm2, %v2744_v13 }
0x1525   :  { %4894 = vmatprep.mubr.msk.f32.mxu1 %vm5197_vm1, %v5196_v36 }
0x154b   :  { %v2505_v22 = vpop.xlane.xlu0 %2504 }
0x154c   :  { %5154 = vrcp.f32 %v2505_v22 }
0x154f   :  { %v2514_v23 = vpop.permute.xlu0 %2513 }
0x1550   :  { %4868 = vmatpush3.msra.mxu0 %v2514_v23 }
0x1551   :  { %4877 = vmatprep.subr.mxu0 %v5196_v36 }
0x1556   :  { %v5155_v24 = vpop.eup %5154 }
0x1557   :  { %v2511_v1 = vmul.f32 %v5155_v24, %v5151_v16 }
0x1559   :  { %4870 = vmatmul.mubr.msk.f32.vlgmr.msra.gmra.mrb[16].mxu0 %vm244_vm2, %v2511_v1 }
0x155a   :  { %4878 = vmatpush3.xpose.msk.msra.mxu0 %vm244_vm2, %v2668_v25  ;;  %4879 = vmatprep.mubr.msk.f32.mxu0 %vm5197_vm1, %v5196_v36 }
0x155b   :  { %4887 = vmatprep.subr.mxu0 %v5196_v36 }
0x155d   :  { %4880 = vmatmul.mubr.msk.f32.vlgmr.msra.gmra.mrb[18].mxu0 %vm244_vm2, %v2666_v63 }
0x155e   :  { %4889 = vmatprep.mubr.msk.f32.mxu0 %vm5197_vm1, %v5196_v36 }
0x15f3   :  { %v5705_v26 = vpop.f32.mrb[30].mxu1 }
0x15f4   :  { %v4876_v27 = vpop.f32.mrb[31].mxu1 }
0x15f7   :  { %v2817_v28 = vpop.f32.mrb[32].mxu1 }
0x15f8   :  { %v2818_v30 = vadd.f32 %v2817_v28, %v5384_v0  ;;  %v4886_v31 = vpop.f32.mrb[33].mxu1 }
0x15fa   :  { %v2824_v34 = vsel %vm244_vm2, %v2818_v30, -inf }
0x15fb   :  { %2825 = vmax.xlane.f32.xlu0 %v2824_v34 }
0x1611   :  { %2919 = vrot.lane.b32.xlu0 %v5641_v53, %s5204_s24 }
0x1615   :  { %3157 = vrot.lane.b32.xlu0 %v5651_v57, %s5205_s25 }
0x1619   :  { %3235 = vrot.lane.b32.xlu0 %v5660_v61, %s5205_s25 }
0x162c   :  { %v5715_v45 = vpop.f32.mrb[16].mxu0 }
0x162d   :  { %v4871_v37 = vpop.f32.mrb[17].mxu0 }
0x162e   :  { %v4502_v37 = vld [vmem:[%s5923_s6 + $0x30] sm:$0xff] }
0x1630   :  { %v2739_v38 = vpop.f32.mrb[18].mxu0 }
0x1631   :  { %v4881_v40 = vpop.f32.mrb[19].mxu0  ;;  %v2740_v46 = vadd.f32 %v2739_v38, %v5381_v59 }
0x1633   :  { %v2821_v47 = vsel %vm244_vm2, %v2740_v46, -inf }
0x1688   :  { %v2826_v29 = vpop.xlane.xlu0 %2825 }
0x1689   :  { %v2828_v35 = vsub.f32 %v2818_v30, %v2826_v29 }
0x168b   :  { %v2831_v33 = vmul.f32 1.442695, %v2828_v35 }
0x168c   :  { %v2920_v42 = vpop.permute.xlu0 %2919 }
0x168d   :  { %5156 = vpow2.f32 %v2831_v33  ;;  %4893 = vmatpush3.msra.mxu1 %v2920_v42 }
0x168e   :  { %4907 = vmatprep.subr.mxu1 %v5196_v36 }
0x1690   :  { %v3158_v56 = vpop.permute.xlu0 %3157 }
0x1694   :  { %v3236_v62 = vpop.permute.xlu0 %3235 }
0x1697   :  { %v5157_v32 = vpop.eup %5156 }
0x1698   :  { %v2836_v44 = vsel %vm244_vm2, %v5157_v32, 0.0 }
0x1699   :  { %2837 = vadd.xlane.f32.xlu1 %v2836_v44 }
0x16aa   :  { %3237 = vrot.lane.b32.xlu1 %v5641_v53, %s5203_s23 }
0x16ce   :  { %2822 = vmax.xlane.f32.xlu1 %v2821_v47 }
0x1726   :  { %v2838_v51 = vpop.xlane.xlu1 %2837 }
0x1727   :  { %5158 = vrcp.f32 %v2838_v51 }
0x172a   :  { %v3238_v58 = vpop.permute.xlu1 %3237 }
0x1731   :  { %v5159_v52 = vpop.eup %5158 }
0x1732   :  { %v2842_v54 = vmul.f32 %v5159_v52, %v5157_v32 }
0x1734   :  { %4895 = vmatmul.mubr.msk.f32.vlgmr.msra.gmra.mrb[34].mxu1 %vm244_vm2, %v2842_v54 }
0x1735   :  { %4908 = vmatpush3.xpose.msk.msra.mxu1 %vm244_vm2, %v3160_v48  ;;  %4909 = vmatprep.mubr.msk.f32.mxu1 %vm5197_vm1, %v5196_v36 }
0x1736   :  { %4912 = vmatprep.subr.mxu1 %v5196_v36 }
0x1738   :  { %4910 = vmatmul.mubr.msk.f32.vlgmr.msra.gmra.mrb[36].mxu1 %vm244_vm2, %v3158_v56 }
0x1739   :  { %4913 = vmatpush3.xpose.msk.msra.mxu1 %vm244_vm2, %v3238_v58  ;;  %4914 = vmatprep.mubr.msk.f32.mxu1 %vm5197_vm1, %v5196_v36 }
0x173a   :  { %4922 = vmatprep.subr.mxu1 %v5196_v36 }
0x173c   :  { %4915 = vmatmul.mubr.msk.f32.vlgmr.msra.gmra.mrb[38].mxu1 %vm244_vm2, %v3236_v62 }
0x173d   :  { %4924 = vmatprep.mubr.msk.f32.mxu1 %vm5197_vm1, %v5196_v36 }
0x175b   :  { %v2823_v2 = vpop.xlane.xlu1 %2822 }
0x175c   :  { %v2827_v3 = vsub.f32 %v2740_v46, %v2823_v2 }
0x175e   :  { %v2829_v4 = vmul.f32 1.442695, %v2827_v3 }
0x1760   :  { %5160 = vpow2.f32 %v2829_v4 }
0x176a   :  { %v5161_v5 = vpop.eup %5160 }
0x176b   :  { %v2833_v6 = vsel %vm244_vm2, %v5161_v5, 0.0 }
0x176c   :  { %2834 = vadd.xlane.f32.xlu0 %v2833_v6 }
0x1782   :  { %2843 = vrot.lane.b32.xlu0 %v5643_v55, %s5204_s24 }
0x1786   :  { %3411 = vrot.lane.b32.xlu0 %v5641_v53, %s5206_s26 }
0x178a   :  { %3572 = vrot.lane.b32.xlu0 %v5643_v55, %s5950_s5 }
0x178e   :  { %3650 = vrot.lane.b32.xlu0 %v5641_v53, %s5950_s5 }
0x1792   :  { %3570 = vrot.lane.b32.xlu0 %v5651_v57, %s5951_s19 }
0x17f9   :  { %v2835_v7 = vpop.xlane.xlu0 %2834 }
0x17fa   :  { %5162 = vrcp.f32 %v2835_v7 }
0x17fd   :  { %v2844_v8 = vpop.permute.xlu0 %2843 }
0x17fe   :  { %4888 = vmatpush3.msra.mxu0 %v2844_v8 }
0x17ff   :  { %4897 = vmatprep.subr.mxu0 %v4501_v18 }
0x1801   :  { %v3412_v9 = vpop.permute.xlu0 %3411 }
0x1802   :  { %4923 = vmatpush3.msra.mxu1 %v3412_v9 }
0x1803   :  { %4932 = vmatprep.subr.mxu1 %v5196_v36 }
0x1804   :  { %v5163_v10 = vpop.eup %5162 }
0x1805   :  { %v2841_v11 = vmul.f32 %v5163_v10, %v5161_v5  ;;  %v3573_v40 = vpop.permute.xlu0 %3572 }
0x1807   :  { %4890 = vmatmul.mubr.msk.f32.vlgmr.msra.gmra.mrb[20].mxu0 %vm244_vm2, %v2841_v11  ;;  %v2991_v12 = vpop.f32.mrb[34].mxu1 }
0x1808   :  { %v4896_v43 = vpop.f32.mrb[35].mxu1  ;;  %4898 = vmatpush3.msra.mxu0 %v4501_v18 }
0x1809   :  { %4902 = vmatprep.subr.mxu0 %v4500_v19  ;;  %v3651_v35 = vpop.permute.xlu0 %3650 }
0x180b   :  { %v3231_v39 = vpop.f32.mrb[36].mxu1 }
0x180c   :  { %v3232_v13 = vadd.f32 %v3231_v39, %v5381_v59  ;;  %v4911_v14 = vpop.f32.mrb[37].mxu1 }
0x180d   :  { %v3571_v42 = vpop.permute.xlu0 %3570 }
0x180e   :  { %v3313_v57 = vsel %vm244_vm2, %v3232_v13, -inf }
0x180f   :  { %3314 = vmax.xlane.f32.xlu1 %v3313_v57  ;;  %v3309_v15 = vpop.f32.mrb[38].mxu1 }
0x1810   :  { %v3310_v41 = vadd.f32 %v3309_v15, %v5384_v0  ;;  %v4916_v16 = vpop.f32.mrb[39].mxu1 }
0x1812   :  { %v3316_v17 = vsel %vm244_vm2, %v3310_v41, -inf }
0x1813   :  { %3317 = vmax.xlane.f32.xlu1 %v3316_v17 }
0x189c   :  { %v3315_v20 = vpop.xlane.xlu1 %3314 }
0x189d   :  { %v3319_v21 = vsub.f32 %v3232_v13, %v3315_v20 }
0x189f   :  { %v3321_v22 = vmul.f32 1.442695, %v3319_v21 }
0x18a0   :  { %v3318_v23 = vpop.xlane.xlu1 %3317 }
0x18a1   :  { %5164 = vpow2.f32 %v3321_v22  ;;  %v3320_v24 = vsub.f32 %v3310_v41, %v3318_v23  ;;  %v4503_v41 = vld [vmem:[%s5923_s6 + $0x38] sm:$0xff] }
0x18a3   :  { %v3323_v25 = vmul.f32 1.442695, %v3320_v24 }
0x18a5   :  { %5166 = vpow2.f32 %v3323_v25 }
0x18ab   :  { %v5165_v1 = vpop.eup %5164 }
0x18ac   :  { %v3325_v63 = vsel %vm244_vm2, %v5165_v1, 0.0 }
0x18ad   :  { %3326 = vadd.xlane.f32.xlu1 %v3325_v63 }
0x18af   :  { %v5167_v27 = vpop.eup %5166 }
0x18b0   :  { %v3328_v28 = vsel %vm244_vm2, %v5167_v27, 0.0 }
0x18b1   :  { %3329 = vadd.xlane.f32.xlu1 %v3328_v28 }
0x18c2   :  { %3335 = vrot.lane.b32.xlu1 %v5643_v55, %s5206_s26  ;;  %s5952_s26 = smov 40  }
0x18c6   :  { %3648 = vrot.lane.b32.xlu1 %v5660_v61, %s5951_s19 }
0x18da   :  { %v2915_v30 = vpop.f32.mrb[20].mxu0 }
0x18db   :  { %v4891_v31 = vpop.f32.mrb[21].mxu0  ;;  %4899 = vmatprep.mubr.msk.f32.mxu0 %vm244_vm2, %v2915_v30 }
0x18dc   :  { %4900 = vmatmul.mubr.msk.f32.vlgmr.msra.gmra.mrb[22].mxu0 %vm244_vm2, %v2991_v12 }
0x18dd   :  { %4904 = vmatprep.mubr.msk.f32.mxu0 %vm244_vm2, %v5715_v45  ;;  %4903 = vmatpush3.msra.mxu0 %v4500_v19  ;;  %v4537_v19 = vld [vmem:[%s5924_s7 + $0x1] ss:$0 sm:$0xff] }
0x18de   :  { %4917 = vmatprep.subr.mxu0 %v5196_v36 }
0x18e4   :  { %4905 = vmatmul.mubr.msk.f32.vlgmr.msra.gmra.mrb[22].mxu0 %vm244_vm2, %v5705_v26 }
0x18e5   :  { %4919 = vmatprep.mubr.msk.f32.mxu0 %vm5197_vm1, %v5196_v36 }
0x193a   :  { %v3327_v34 = vpop.xlane.xlu1 %3326 }
0x193b   :  { %5168 = vrcp.f32 %v3327_v34 }
0x193e   :  { %v3330_v61 = vpop.xlane.xlu1 %3329 }
0x193f   :  { %5170 = vrcp.f32 %v3330_v61 }
0x1942   :  { %v3336_v38 = vpop.permute.xlu1 %3335 }
0x1943   :  { %4918 = vmatpush3.msra.mxu0 %v3336_v38 }
0x1944   :  { %4927 = vmatprep.subr.mxu0 %v4502_v37 }
0x1945   :  { %v5169_v45 = vpop.eup %5168 }
0x1946   :  { %v3333_v29 = vmul.f32 %v5169_v45, %v5165_v1  ;;  %v3649_v48 = vpop.permute.xlu1 %3648  ;;  %v4543_v45 = vld [vmem:[%s5925_s10 + $0x28] sm:$0xff] }
0x1948   :  { %4920 = vmatmul.mubr.msk.f32.vlgmr.msra.gmra.mrb[24].mxu0 %vm244_vm2, %v3333_v29 }
0x1949   :  { %v5171_v26 = vpop.eup %5170  ;;  %4928 = vmatpush3.msra.mxu0 %v4502_v37 }
0x194a   :  { %v3334_v33 = vmul.f32 %v5171_v26, %v5167_v27  ;;  %4937 = vmatprep.subr.mxu0 %v5196_v36  ;;  %v4544_v26 = vld [vmem:[%s5925_s10 + $0x30] sm:$0xff] }
0x194c   :  { %4925 = vmatmul.mubr.msk.f32.vlgmr.msra.gmra.mrb[40].mxu1 %vm244_vm2, %v3334_v33 }
0x194d   :  { %4933 = vmatpush3.xpose.msk.msra.mxu1 %vm244_vm2, %v3573_v40  ;;  %4934 = vmatprep.mubr.msk.f32.mxu1 %vm5197_vm1, %v5196_v36 }
0x194e   :  { %4942 = vmatprep.subr.mxu1 %v5196_v36 }
0x1950   :  { %4935 = vmatmul.mubr.msk.f32.vlgmr.msra.gmra.mrb[42].mxu1 %vm244_vm2, %v3571_v42 }
0x1951   :  { %4944 = vmatprep.mubr.msk.f32.mxu1 %vm5197_vm1, %v5196_v36 }
0x1a1b   :  { %v3407_v32 = vpop.f32.mrb[24].mxu0 }
0x1a1c   :  { %v4921_v44 = vpop.f32.mrb[25].mxu0  ;;  %4929 = vmatprep.mubr.msk.f32.mxu0 %vm244_vm2, %v3407_v32 }
0x1a1f   :  { %v3483_v46 = vpop.f32.mrb[40].mxu1 }
0x1a20   :  { %v4926_v47 = vpop.f32.mrb[41].mxu1  ;;  %4930 = vmatmul.mubr.msk.f32.vlgmr.msra.gmra.mrb[22].mxu0 %vm244_vm2, %v3483_v46 }
0x1a21   :  { %4938 = vmatpush3.xpose.msk.msra.mxu0 %vm244_vm2, %v3651_v35  ;;  %4939 = vmatprep.mubr.msk.f32.mxu0 %vm5197_vm1, %v5196_v36  ;;  %v4545_v35 = vld [vmem:[%s5925_s10 + $0x38] sm:$0xff] }
0x1a22   :  { %4947 = vmatprep.subr.mxu0 %v5196_v36  ;;  %v5042_v33 = vpack.c.bf16 %v4545_v35, %v4544_v26 }
0x1a23   :  { %v3644_v51 = vpop.f32.mrb[42].mxu1 }
0x1a24   :  { %v3645_v52 = vadd.f32 %v3644_v51, %v5381_v59  ;;  %v4936_v54 = vpop.f32.mrb[43].mxu1  ;;  %4940 = vmatmul.mubr.msk.f32.vlgmr.msra.gmra.mrb[26].mxu0 %vm244_vm2, %v3649_v48 }
0x1a25   :  { %4949 = vmatprep.mubr.msk.f32.mxu0 %vm5197_vm1, %v5196_v36 }
0x1a26   :  { %v3726_v56 = vsel %vm244_vm2, %v3645_v52, -inf }
0x1a27   :  { %3727 = vmax.xlane.f32.xlu0 %v3726_v56 }
0x1ab4   :  { %v3728_v58 = vpop.xlane.xlu0 %3727 }
0x1ab5   :  { %v3732_v62 = vsub.f32 %v3645_v52, %v3728_v58  ;;  %v4540_v52 = vld [vmem:[%s5926_s8 + $0x1] ss:$0 sm:$0xff] }
0x1ab7   :  { %v3734_v2 = vmul.f32 1.442695, %v3732_v62  ;;  %v4541_v62 = vld [vmem:[%s5927_s9 + $0x1] ss:$0 sm:$0xff] }
0x1ab9   :  { %5172 = vpow2.f32 %v3734_v2 }
0x1ac3   :  { %v5173_v3 = vpop.eup %5172 }
0x1ac4   :  { %v3738_v4 = vsel %vm244_vm2, %v5173_v3, 0.0 }
0x1ac5   :  { %3739 = vadd.xlane.f32.xlu0 %v3738_v4 }
0x1af7   :  { %v3722_v5 = vpop.f32.mrb[26].mxu0 }
0x1af8   :  { %v3723_v59 = vadd.f32 %v3722_v5, %v5384_v0  ;;  %v4941_v6 = vpop.f32.mrb[27].mxu0 }
0x1af9   :  { %v4551_v6 = vld [vmem:[%s5928_s12 + $0x48] sm:$0xff] }
0x1afa   :  { %v3729_v7 = vsel %vm244_vm2, %v3723_v59, -inf }
0x1afb   :  { %3730 = vmax.xlane.f32.xlu1 %v3729_v7 }
0x1b0c   :  { %3824 = vrot.lane.b32.xlu1 %v5641_v53, %s5952_s26 }
0x1b52   :  { %v3740_v0 = vpop.xlane.xlu0 %3739 }
0x1b88   :  { %v3731_v8 = vpop.xlane.xlu1 %3730 }
0x1b89   :  { %v3733_v9 = vsub.f32 %v3723_v59, %v3731_v8  ;;  %v4550_v59 = vld [vmem:[%s5928_s12 + $0x40] sm:$0xff]  ;;  %v4552_v8 = vld [vmem:[%s5928_s12 + $0x50] sm:$0xff] }
0x1b8a   :  { %v5046_v7 = vpack.c.bf16 %v4551_v6, %v4550_v59 }
0x1b8b   :  { %v3736_v10 = vmul.f32 1.442695, %v3733_v9  ;;  %v4553_v9 = vld [vmem:[%s5928_s12 + $0x58] sm:$0xff] }
0x1b8c   :  { %v3825_v11 = vpop.permute.xlu1 %3824 }
0x1b8d   :  { %5174 = vpow2.f32 %v3736_v10  ;;  %4948 = vmatpush3.msra.mxu0 %v3825_v11  ;;  %v4554_v10 = vld [vmem:[%s5928_s12 + $0x60] sm:$0xff]  ;;  %v4555_v11 = vld [vmem:[%s5928_s12 + $0x68] sm:$0xff] }
0x1b8e   :  { %5176 = vrcp.f32 %v3740_v0  ;;  %4952 = vmatprep.subr.mxu0 %v4503_v41  ;;  %v4557_v0 = vld [vmem:[%s5928_s12 + $0x78] sm:$0xff] }
0x1b97   :  { %v5175_v12 = vpop.eup %5174 }
0x1b98   :  { %v3741_v43 = vsel %vm244_vm2, %v5175_v12, 0.0  ;;  %v5177_v13 = vpop.eup %5176 }
0x1b99   :  { %3742 = vadd.xlane.f32.xlu0 %v3741_v43  ;;  %v3746_v14 = vmul.f32 %v5177_v13, %v5173_v3  ;;  %v4556_v43 = vld [vmem:[%s5928_s12 + $0x70] sm:$0xff]  ;;  %v4547_v13 = vld [vmem:[%s5929_s11 + $0x1] ss:$0 sm:$0xff] }
0x1baf   :  { %3748 = vrot.lane.b32.xlu0 %v5643_v55, %s5952_s26 }
0x1c26   :  { %v3743_v39 = vpop.xlane.xlu0 %3742 }
0x1c27   :  { %5178 = vrcp.f32 %v3743_v39  ;;  %v5058_v39 = vpack.c.bf16 %v4557_v0, %v4556_v43 }
0x1c2a   :  { %v3749_v53 = vpop.permute.xlu0 %3748 }
0x1c2b   :  { %4943 = vmatpush3.msra.mxu1 %v3749_v53 }
0x1c2c   :  { %4945 = vmatmul.mubr.msk.f32.vlgmr.msra.gmra.mrb[44].mxu1 %vm244_vm2, %v3746_v14 }
0x1c31   :  { %v5179_v57 = vpop.eup %5178 }
0x1c32   :  { %v3747_v15 = vmul.f32 %v5179_v57, %v5175_v12  ;;  %v5054_v12 = vpack.c.bf16 %v4555_v11, %v4554_v10  ;;  %v4559_v10 = vld [vmem:[%s5930_s13 + $0x1] ss:$0 sm:$0xff] }
0x1c34   :  { %4950 = vmatmul.mubr.msk.f32.vlgmr.msra.gmra.mrb[28].mxu0 %vm244_vm2, %v3747_v15 }
0x1c35   :  { %4953 = vmatpush3.msra.mxu0 %v4503_v41 }
0x1c36   :  { %5047 = vmatprep.subr.bf16.mxu0 %v5046_v7 }
0x1cff   :  { %v3820_v55 = vpop.f32.mrb[44].mxu1 }
0x1d00   :  { %v4946_v16 = vpop.f32.mrb[45].mxu1  ;;  %4954 = vmatprep.mubr.msk.f32.mxu0 %vm244_vm2, %v3820_v55 }
0x1d07   :  { %v3896_v17 = vpop.f32.mrb[28].mxu0 }
0x1d08   :  { %v4951_v18 = vpop.f32.mrb[29].mxu0  ;;  %4955 = vmatmul.mubr.msk.f32.vlgmr.msra.gmra.mrb[22].mxu0 %vm244_vm2, %v3896_v17 }
0x1d09   :  { %5049 = vmatpush3.bf16.msra.mxu0 %v5046_v7 }
0x1ddb   :  { %v4956_v20 = vpop.f32.mrb[22].mxu0 }
0x1ddc   :  { %v3992_v21 = vadd.f32 %v4956_v20, %v4537_v19  ;;  %v3972_v22 = vpop.f32.mrb[23].mxu0 }
0x1ddd   :  { %v3991_v23 = vadd.f32 %v4537_v19, %v3972_v22 }
0x1dde   :  { %v3994_v24 = vadd.f32 %v3992_v21, %v5630_v50 }
0x1ddf   :  { %v3993_v25 = vadd.f32 %v3991_v23, %v5628_v49  ;;  %v4542_v49 = vld [vmem:[%s5925_s10 + $0x20] sm:$0xff] }
0x1de0   :  { %v4002_v1 = vsel %vm63_vm0, %v3994_v24, 0.0  ;;  %v5038_v29 = vpack.c.bf16 %v4543_v45, %v4542_v49 }
0x1de1   :  { %4003 = vadd.xlane.f32.xlu0 %v4002_v1  ;;  %v3999_v63 = vsel %vm63_vm0, %v3993_v25, 0.0 }
0x1de2   :  { %4000 = vadd.xlane.f32.xlu1 %v3999_v63  ;;  %5039 = vmatprep.subr.bf16.mxu1 %v5038_v29 }
0x1de3   :  { %5041 = vmatpush3.bf16.msra.mxu1 %v5038_v29 }
0x1de4   :  { %5043 = vmatprep.subr.bf16.mxu1 %v5042_v33 }
0x1de7   :  { %5045 = vmatpush3.bf16.msra.mxu1 %v5042_v33 }
0x1e6e   :  { %v4004_v27 = vpop.xlane.xlu0 %4003 }
0x1e6f   :  { %v4006_v28 = vmul.f32 0.03125, %v4004_v27  ;;  %v4001_v30 = vpop.xlane.xlu1 %4000 }
0x1e70   :  { %v4005_v31 = vmul.f32 0.03125, %v4001_v30 }
0x1e71   :  { %v4008_v34 = vsub.f32 %v3994_v24, %v4006_v28 }
0x1e72   :  { %v4007_v61 = vsub.f32 %v3993_v25, %v4005_v31 }
0x1e73   :  { %v4010_v37 = vmul.f32 %v4008_v34, %v4008_v34 }
0x1e74   :  { %v4009_v38 = vmul.f32 %v4007_v61, %v4007_v61 }
0x1e75   :  { %v4014_v40 = vsel %vm63_vm0, %v4010_v37, 0.0 }
0x1e76   :  { %4015 = vadd.xlane.f32.xlu1 %v4014_v40  ;;  %v4011_v50 = vsel %vm63_vm0, %v4009_v38, 0.0 }
0x1e77   :  { %4012 = vadd.xlane.f32.xlu0 %v4011_v50 }
0x1f03   :  { %v4016_v42 = vpop.xlane.xlu1 %4015 }
0x1f04   :  { %v4018_v32 = vmul.f32 0.03125, %v4016_v42  ;;  %v4013_v44 = vpop.xlane.xlu0 %4012 }
0x1f05   :  { %v4017_v46 = vmul.f32 0.03125, %v4013_v44 }
0x1f06   :  { %v4020_v47 = vadd.f32 1e-12, %v4018_v32 }
0x1f07   :  { %v4019_v48 = vadd.f32 1e-12, %v4017_v46 }
0x1f08   :  { %5180 = vrsqrt.f32 %v4020_v47 }
0x1f09   :  { %5182 = vrsqrt.f32 %v4019_v48 }
0x1f12   :  { %v5181_v51 = vpop.eup %5180 }
0x1f13   :  { %v5183_v54 = vpop.eup %5182  ;;  %v4024_v56 = vmul.f32 %v5181_v51, %v4008_v34 }
0x1f14   :  { %v4023_v58 = vmul.f32 %v5183_v54, %v4007_v61 }
0x1f15   :  { %v4032_v2 = vmul.f32 %v4540_v52, %v4024_v56 }
0x1f16   :  { %v4031_v3 = vmul.f32 %v4540_v52, %v4023_v58 }
0x1f17   :  { %v5842_v5 = vadd.f32 %v4541_v62, %v4032_v2 }
0x1f18   :  { %v5840_v4 = vadd.f32 %v4541_v62, %v4031_v3 }
0x1f1a   :  { %4965 = vmatprep.mubr.msk.f32.mxu1 %vm63_vm0, %v5840_v4 }
0x1f1b   :  { %4966 = vmatmul.mubr.msk.f32.vlgmr.msra.gmra.mrb[46].mxu1 %vm63_vm0, %v5842_v5 }
0x1f1c   :  { %4995 = vmatprep.mubr.msk.f32.mxu1 %vm5197_vm1, %v5196_v36  ;;  %v5050_v36 = vpack.c.bf16 %v4553_v9, %v4552_v8 }
0x1f1e   :  { %5051 = vmatprep.subr.bf16.mxu0 %v5050_v36 }
0x1f1f   :  { %5053 = vmatpush3.bf16.msra.mxu0 %v5050_v36 }
0x1f20   :  { %5055 = vmatprep.subr.bf16.mxu0 %v5054_v12 }
0x1f23   :  { %5057 = vmatpush3.bf16.msra.mxu0 %v5054_v12 }
0x1f24   :  { %5059 = vmatprep.subr.bf16.mxu0 %v5058_v39 }
0x1f27   :  { %5061 = vmatpush3.bf16.msra.mxu0 %v5058_v39 }
0x1fee   :  { %v4967_v14 = vpop.f32.mrb[46].mxu1 }
0x1fef   :  { %v4132_v53 = vadd.f32 %v4967_v14, %v4547_v13  ;;  %v4126_v57 = vpop.f32.mrb[47].mxu1 }
0x1ff0   :  { %v4127_v15 = vadd.f32 %v4547_v13, %v4126_v57 }
0x1ff1   :  { %v4138_v41 = vmul.f32 0.70710677, %v4132_v53  ;;  %v4136_v8 = vmul.f32 0.5, %v4132_v53 }
0x1ff2   :  { %v4137_v55 = vmul.f32 0.70710677, %v4127_v15  ;;  %v4135_v6 = vmul.f32 0.5, %v4127_v15 }
0x1ff3   :  { %v4144_v16 = vand.u32 2147483647, %v4138_v41  ;;  %vm4140_vm6 = vcmp.ge.f32.partialorder %v4138_v41, 0.0 }
0x1ff4   :  { %v4143_v17 = vand.u32 2147483647, %v4137_v55  ;;  %vm4139_vm7 = vcmp.ge.f32.partialorder %v4137_v55, 0.0  ;;  %v4142_v56 = vsel %vm4140_vm6, 1.0, %v5210_v60 }
0x1ff5   :  { %v4146_v18 = vmul.f32 0.3275911, %v4144_v16  ;;  %v4172_v22 = vsub.f32 0.0, %v4144_v16  ;;  %v4141_v2 = vsel %vm4139_vm7, 1.0, %v5210_v60 }
0x1ff6   :  { %v4145_v19 = vmul.f32 0.3275911, %v4143_v17  ;;  %v4171_v23 = vsub.f32 0.0, %v4143_v17 }
0x1ff7   :  { %v4148_v20 = vadd.f32 1.0, %v4146_v18  ;;  %v4174_v25 = vmul.f32 %v4172_v22, %v4144_v16  ;;  %v4354_v22 = vld [vmem:[%s5933_s16 + $0x10] sm:$0xff] }
0x1ff8   :  { %v4147_v21 = vadd.f32 1.0, %v4145_v19  ;;  %v4173_v27 = vmul.f32 %v4171_v23, %v4143_v17 }
0x1ff9   :  { %5184 = vrcp.f32 %v4148_v20  ;;  %v4177_v31 = vmul.f32 1.442695, %v4174_v25  ;;  %v4352_v20 = vld [vmem:[%s5933_s16] sm:$0xff] }
0x1ffa   :  { %5186 = vrcp.f32 %v4147_v21  ;;  %v4175_v37 = vmul.f32 1.442695, %v4173_v27  ;;  %v4353_v21 = vld [vmem:[%s5933_s16 + $0x8] sm:$0xff] }
0x1ffb   :  { %5188 = vpow2.f32 %v4177_v31  ;;  %v5063_v23 = vpack.c.bf16 %v4353_v21, %v4352_v20 }
0x1ffc   :  { %5190 = vpow2.f32 %v4175_v37 }
0x2003   :  { %v5185_v24 = vpop.eup %5184 }
0x2004   :  { %v5187_v1 = vpop.eup %5186  ;;  %v4154_v63 = vmul.f32 1.0614054, %v5185_v24 }
0x2005   :  { %v4153_v28 = vmul.f32 1.0614054, %v5187_v1  ;;  %v5189_v46 = vpop.eup %5188 }
0x2006   :  { %v4156_v30 = vadd.f32 -1.4531521, %v4154_v63  ;;  %v5191_v48 = vpop.eup %5190 }
0x2007   :  { %v4155_v34 = vadd.f32 -1.4531521, %v4153_v28 }
0x2008   :  { %v4158_v61 = vmul.f32 %v5185_v24, %v4156_v30 }
0x2009   :  { %v4157_v38 = vmul.f32 %v5187_v1, %v4155_v34 }
0x200a   :  { %v4160_v40 = vadd.f32 1.4214138, %v4158_v61  ;;  %v4564_v61 = vld [vmem:[%s5931_s14 + $0x1] ss:$0 sm:$0xff] }
0x200b   :  { %v4159_v50 = vadd.f32 1.4214138, %v4157_v38 }
0x200c   :  { %v4162_v49 = vmul.f32 %v5185_v24, %v4160_v40  ;;  %v4565_v40 = vld [vmem:[%s5932_s15 + $0x1] ss:$0 sm:$0xff] }
0x200d   :  { %v4161_v45 = vmul.f32 %v5187_v1, %v4159_v50 }
0x200e   :  { %v4164_v29 = vadd.f32 -0.28449672, %v4162_v49 }
0x200f   :  { %v4163_v26 = vadd.f32 -0.28449672, %v4161_v45 }
0x2010   :  { %v4166_v35 = vmul.f32 %v5185_v24, %v4164_v29 }
0x2011   :  { %v4165_v33 = vmul.f32 %v5187_v1, %v4163_v26 }
0x2012   :  { %v4168_v42 = vadd.f32 0.2548296, %v4166_v35 }
0x2013   :  { %v4167_v32 = vadd.f32 0.2548296, %v4165_v33 }
0x2014   :  { %v4170_v44 = vmul.f32 %v5185_v24, %v4168_v42  ;;  %v4355_v24 = vld [vmem:[%s5933_s16 + $0x18] sm:$0xff] }
0x2015   :  { %v4169_v47 = vmul.f32 %v5187_v1, %v4167_v32  ;;  %v5066_v25 = vpack.c.bf16 %v4355_v24, %v4354_v22 }
0x2016   :  { %v4180_v51 = vmul.f32 %v5189_v46, %v4170_v44 }
0x2017   :  { %v4179_v52 = vmul.f32 %v5191_v48, %v4169_v47 }
0x2018   :  { %v4182_v54 = vsub.f32 1.0, %v4180_v51 }
0x2019   :  { %v4181_v58 = vsub.f32 1.0, %v4179_v52 }
0x201a   :  { %v4184_v62 = vmul.f32 %v4182_v54, %v4142_v56 }
0x201b   :  { %v4183_v3 = vmul.f32 %v4181_v58, %v4141_v2 }
0x201c   :  { %v4186_v59 = vadd.f32 1.0, %v4184_v62 }
0x201d   :  { %v4185_v7 = vadd.f32 1.0, %v4183_v3 }
0x201e   :  { %v4188_v36 = vmul.f32 %v4186_v59, %v4136_v8 }
0x201f   :  { %v4187_v9 = vmul.f32 %v4185_v7, %v4135_v6  ;;  %v4566_v6 = vld [vmem:[%s5934_s17] ss:$0 sm:$0xff] }
0x2021   :  { %4984 = vmatprep.mubr.msk.f32.mxu0 %vm2106_vm5, %v4187_v9 }
0x2022   :  { %4985 = vmatmul.mubr.msk.f32.vlgmr.msra.gmra.mrb[30].mxu0 %vm2106_vm5, %v4188_v36 }
0x20f5   :  { %v4986_v11 = vpop.f32.mrb[30].mxu0 }
0x20f6   :  { %v4284_v12 = vadd.f32 %v4986_v11, %v4559_v10  ;;  %v4278_v43 = vpop.f32.mrb[31].mxu0 }
0x20f7   :  { %v4279_v0 = vadd.f32 %v4559_v10, %v4278_v43 }
0x20f8   :  { %v4288_v60 = vadd.f32 %v4284_v12, %v5842_v5 }
0x20f9   :  { %v4287_v39 = vadd.f32 %v4279_v0, %v5840_v4  ;;  %v5211_v4 = vmov 0.0|0.0  }
0x20fa   :  { %v4296_v13 = vsel %vm63_vm0, %v4288_v60, 0.0  ;;  %5062 = vmatprep.subr.bf16.mxu1 %v5211_v4 }
0x20fb   :  { %4297 = vadd.xlane.f32.xlu1 %v4296_v13  ;;  %v4293_v14 = vsel %vm63_vm0, %v4287_v39, 0.0  ;;  %5064 = vmatpush3.bf16.msra.mxu1 %v5063_v23 }
0x20fc   :  { %4294 = vadd.xlane.f32.xlu0 %v4293_v14  ;;  %5065 = vmatprep.subr.bf16.mxu1 %v5211_v4 }
0x20ff   :  { %5067 = vmatpush3.bf16.msra.mxu1 %v5066_v25 }
0x2188   :  { %v4298_v53 = vpop.xlane.xlu1 %4297 }
0x2189   :  { %v4300_v57 = vmul.f32 0.03125, %v4298_v53  ;;  %v4295_v15 = vpop.xlane.xlu0 %4294 }
0x218a   :  { %v4299_v41 = vmul.f32 0.03125, %v4295_v15 }
0x218b   :  { %v4302_v55 = vsub.f32 %v4288_v60, %v4300_v57 }
0x218c   :  { %v4301_v16 = vsub.f32 %v4287_v39, %v4299_v41 }
0x218d   :  { %v4304_v17 = vmul.f32 %v4302_v55, %v4302_v55 }
0x218e   :  { %v4303_v18 = vmul.f32 %v4301_v16, %v4301_v16 }
0x218f   :  { %v4308_v19 = vsel %vm63_vm0, %v4304_v17, 0.0 }
0x2190   :  { %4309 = vadd.xlane.f32.xlu1 %v4308_v19  ;;  %v4305_v5 = vsel %vm63_vm0, %v4303_v18, 0.0 }
0x2191   :  { %4306 = vadd.xlane.f32.xlu0 %v4305_v5 }
0x221d   :  { %v4310_v1 = vpop.xlane.xlu1 %4309 }
0x221e   :  { %v4312_v63 = vmul.f32 0.03125, %v4310_v1  ;;  %v4307_v27 = vpop.xlane.xlu0 %4306 }
0x221f   :  { %v4311_v28 = vmul.f32 0.03125, %v4307_v27 }
0x2220   :  { %v4314_v30 = vadd.f32 1e-12, %v4312_v63 }
0x2221   :  { %v4313_v31 = vadd.f32 1e-12, %v4311_v28 }
0x2222   :  { %5192 = vrsqrt.f32 %v4314_v30 }
0x2223   :  { %5194 = vrsqrt.f32 %v4313_v31 }
0x222c   :  { %v5193_v34 = vpop.eup %5192 }
0x222d   :  { %v5195_v37 = vpop.eup %5194  ;;  %v4318_v38 = vmul.f32 %v5193_v34, %v4302_v55 }
0x222e   :  { %v4317_v50 = vmul.f32 %v5195_v37, %v4301_v16 }
0x222f   :  { %v4326_v49 = vmul.f32 %v4564_v61, %v4318_v38 }
0x2230   :  { %v4325_v45 = vmul.f32 %v4564_v61, %v4317_v50 }
0x2231   :  { %v4334_v29 = vadd.f32 %v4565_v40, %v4326_v49 }
0x2232   :  { %v4333_v26 = vadd.f32 %v4565_v40, %v4325_v45 }
0x2233   :  { %v4342_v35 = vsel %vm63_vm0, %v4334_v29, 0.0 }
0x2234   :  { %v4335_v33 = vsel %vm63_vm0, %v4333_v26, 0.0  ;;  %v4343_v42 = vrot.slane %v4342_v35, 4 }
0x2235   :  { %v4336_v32 = vrot.slane %v4335_v33, 4 }
0x2236   :  { %v4344_v44 = vadd.f32 %v4343_v42, %v4342_v35 }
0x2237   :  { %v4337_v46 = vadd.f32 %v4336_v32, %v4335_v33 }
0x2238   :  { %v4345_v47 = vrot.slane %v4344_v44, 2 }
0x2239   :  { %v4338_v48 = vrot.slane %v4337_v46, 2 }
0x223a   :  { %v4346_v51 = vadd.f32 %v4345_v47, %v4344_v44 }
0x223b   :  { %v4339_v52 = vadd.f32 %v4338_v48, %v4337_v46 }
0x223c   :  { %v4347_v54 = vrot.slane %v4346_v51, 1 }
0x223d   :  { %v4340_v56 = vrot.slane %v4339_v52, 1 }
0x223e   :  { %v4348_v58 = vadd.f32 %v4347_v54, %v4346_v51 }
0x223f   :  { %v4341_v62 = vadd.f32 %v4340_v56, %v4339_v52 }
0x2240   :  { %v4351_v2 = vmul.f32 0.125, %v4348_v58 }
0x2241   :  { %v4350_v3 = vmul.f32 0.125, %v4341_v62 }
0x2243   :  { %v4366_v59 = vsel %vm4365_vm8, %v4351_v2, %v4350_v3 }
0x2244   :  { %4996 = vmatmul.mubr.msk.f32.vlgmr.msra.gmra.mrb[48].mxu1 %vm63_vm0, %v4366_v59 }
0x2317   :  { %v4435_v7 = vpop.f32.mrb[48].mxu1 }
0x2318   :  { %v4436_v8 = vadd.f32 %v4566_v6, %v4435_v7  ;;  %v4997_v9 = vpop.f32.mrb[49].mxu1 }
0x231a   :  { %4439 = vst [vmem:[%s5935_s18] sm:$0x3] %v4436_v8 }

</bundles_post_ra>
